<compile_context>
chip_gen: v6e
topology: v6e:2x2x1
jax: 0.10.0
libtpu: 0.0.40
codegen_flags: <defaults>
</compile_context>

<pallas_src>
import jax
import jax.numpy as jnp
from jax.experimental import pallas as pl
from jax.experimental.pallas import tpu as pltpu

N_PAD = 128          # padded matrix side (lane-aligned, one MXU tile)
K_SQUARINGS = 10     # J^(2^10) = J^1024 : Gelfand spectral-radius estimate


def _spectral_radius_kernel(w_ref, gain_ref, out_ref):
    # w_ref   : VMEM (128,128) -> zero-padded sub-circuit W
    # gain_ref: VMEM (128,1)   -> zero-padded gains diag(f'(r*))
    # out_ref : VMEM (1,1)     -> spectral-radius estimate of J = diag(gain) @ W

    # J = diag(gain) @ W  (gain broadcast along lanes; VPU elementwise)
    M = gain_ref[...] * w_ref[...]                                   # (128,128)

    log_acc = jnp.zeros((1, 1), jnp.float32)
    coeff = 1.0                                                      # 2^{-k}

    # Fully unrolled repeated squaring with max-abs rescale (overflow guard).
    # After K steps:  M = J^(2^K) * prod_k inv_k^(2^(K-k))
    for _ in range(K_SQUARINGS):
        s = jnp.maximum(jnp.max(jnp.abs(M), keepdims=True), 1e-30)   # (1,1) XLU reduce
        inv = 1.0 / s
        log_acc = log_acc - coeff * jnp.log(inv)                     # exact bookkeeping
        A = M * inv                                                  # VPU rescale
        M = jnp.dot(A, A, preferred_element_type=jnp.float32)        # MXU 128^3
        coeff *= 0.5
    # coeff == 2^{-K}

    # rho(J) ~= ||J^(2^K)||_F ^ (2^{-K}), assembled in log space.
    sumsq = jnp.sum(M * M, keepdims=True)                            # (1,1)
    log_rho = log_acc + (0.5 * coeff) * jnp.log(sumsq + 1e-38)
    out_ref[...] = jnp.exp(log_rho)


@jax.jit
def _subcircuit_instability(sub_W_flat, gain):
    """Spectral radius of diag(gain) @ sub_W_flat via the Pallas kernel."""
    N = sub_W_flat.shape[0]
    W_pad = jnp.zeros((N_PAD, N_PAD), jnp.float32).at[:N, :N].set(sub_W_flat)
    g_pad = jnp.zeros((N_PAD, 1), jnp.float32).at[:N, 0].set(gain)

    rho = pl.pallas_call(
        _spectral_radius_kernel,
        out_shape=jax.ShapeDtypeStruct((1, 1), jnp.float32),
        in_specs=[
            pl.BlockSpec(memory_space=pltpu.MemorySpace.VMEM),   # W padded
            pl.BlockSpec(memory_space=pltpu.MemorySpace.VMEM),   # gain padded
        ],
        out_specs=pl.BlockSpec(memory_space=pltpu.MemorySpace.VMEM),
    )(W_pad, g_pad)
    return rho[0, 0]


class ParadoxicalCon:
    """JAX/Pallas port of fr_models.constraints.ParadoxicalCon (INEQ constraint)."""

    def __init__(self, cell_type, min_subcircuit_instability=1.01, **kwargs):
        self.cell_type = cell_type
        self.min_subcircuit_instability = float(min_subcircuit_instability)
        self.kwargs = kwargs

    def __call__(self, W_expanded, r_star, k=0.04, power=2.0):
        # W_expanded: (n, B, n, B) float32 ; r_star: (n, B) float32 (> 0)
        n = W_expanded.shape[0]
        cell_types = [i for i in range(n) if i != self.cell_type]
        idx = jnp.array(cell_types, dtype=jnp.int32)

        # glue: torch.take along both cell-type axes
        sub_W = W_expanded[idx][:, :, idx, :]                 # (n-1, B, n-1, B)
        sub_r_star = r_star[idx]                              # (n-1, B)

        B = sub_W.shape[1]
        N = len(cell_types) * B
        assert N <= N_PAD, "sub-circuit larger than one padded MXU tile"
        sub_W_flat = sub_W.reshape(N, N).astype(jnp.float32)

        # power-law SSN gain f'(x) at fixed point:  p * k^(1/p) * r*^((p-1)/p)
        gain = (power * (k ** (1.0 / power))
                * sub_r_star ** ((power - 1.0) / power)).reshape(N).astype(jnp.float32)

        # INEQ constraint value; min is subtracted outside the kernel (no SMEM operand).
        return _subcircuit_instability(sub_W_flat, gain) - self.min_subcircuit_instability


if __name__ == "__main__":
    key = jax.random.PRNGKey(0)
    n, B = 4, 16                                   # 4 cell types, 16 spatial positions
    k_w, k_r = jax.random.split(key)

    # deterministic synthetic expanded weights and fixed-point rates
    W_expanded = 0.1 * jax.random.normal(k_w, (n, B, n, B), dtype=jnp.float32)
    r_star = jax.nn.softplus(jax.random.normal(k_r, (n, B), dtype=jnp.float32)) + 0.1

    con = ParadoxicalCon(cell_type=0, min_subcircuit_instability=1.01)
    result = con(W_expanded, r_star)
    jax.block_until_ready(result)
    print("KERNEL_OK")
</pallas_src>

<mosaic_0001>
module attributes {stable_mosaic.version = 11 : i64} {
  func.func @_spectral_radius_kernel(%arg0: memref<128x128xf32, #tpu.memory_space<vmem>>, %arg1: memref<128x1xf32, #tpu.memory_space<vmem>>, %arg2: memref<1x1xf32, #tpu.memory_space<vmem>>) attributes {dimension_semantics = [], scalar_prefetch = 0 : i64, scratch_operands = 0 : i64, tpu.core_type = #tpu.core_type<tc>} {
    %c0 = arith.constant 0 : index
    %c0_0 = arith.constant 0 : index
    %0 = vector.load %arg1[%c0, %c0_0] : memref<128x1xf32, #tpu.memory_space<vmem>>, vector<128x1xf32>
    %c0_1 = arith.constant 0 : index
    %c0_2 = arith.constant 0 : index
    %1 = vector.load %arg0[%c0_1, %c0_2] : memref<128x128xf32, #tpu.memory_space<vmem>>, vector<128x128xf32>
    %2 = vector.broadcast %0 : vector<128x1xf32> to vector<128x128xf32>
    %3 = arith.mulf %2, %1 : vector<128x128xf32>
    %cst = arith.constant 0.000000e+00 : f32
    %4 = vector.broadcast %cst : f32 to vector<1x1xf32>
    %5 = math.absf %3 : vector<128x128xf32>
    %6 = vector.shape_cast %5 : vector<128x128xf32> to vector<1x128x128xf32>
    %cst_3 = arith.constant dense<0xFF800000> : vector<1xf32>
    %7 = vector.multi_reduction <maximumf>, %6, %cst_3 [1, 2] : vector<1x128x128xf32> to vector<1xf32>
    %8 = vector.shape_cast %7 : vector<1xf32> to vector<1x1x1xf32>
    %9 = vector.extract %8[0, 0, 0] : f32 from vector<1x1x1xf32>
    %10 = vector.broadcast %9 : f32 to vector<1x1xf32>
    %cst_4 = arith.constant 1.000000e-30 : f32
    %11 = vector.broadcast %cst_4 : f32 to vector<1x1xf32>
    %12 = arith.maximumf %10, %11 : vector<1x1xf32>
    %cst_5 = arith.constant 1.000000e+00 : f32
    %13 = vector.broadcast %cst_5 : f32 to vector<1x1xf32>
    %14 = arith.divf %13, %12 : vector<1x1xf32>
    %15 = math.log %14 : vector<1x1xf32>
    %cst_6 = arith.constant 1.000000e+00 : f32
    %16 = vector.broadcast %cst_6 : f32 to vector<1x1xf32>
    %17 = arith.mulf %16, %15 : vector<1x1xf32>
    %18 = arith.subf %4, %17 : vector<1x1xf32>
    %19 = vector.broadcast %14 : vector<1x1xf32> to vector<128x128xf32>
    %20 = arith.mulf %3, %19 : vector<128x128xf32>
    %cst_7 = arith.constant dense<0.000000e+00> : vector<128x128xf32>
    %21 = tpu.matmul %20, %20, %cst_7 {dimension_numbers = #tpu.dot_dimension_numbers<[1], [0], [0], [1], [0, 0, 1, 1], [], []>} : vector<128x128xf32>, vector<128x128xf32>, vector<128x128xf32> -> vector<128x128xf32>
    %22 = math.absf %21 : vector<128x128xf32>
    %23 = vector.shape_cast %22 : vector<128x128xf32> to vector<1x128x128xf32>
    %cst_8 = arith.constant dense<0xFF800000> : vector<1xf32>
    %24 = vector.multi_reduction <maximumf>, %23, %cst_8 [1, 2] : vector<1x128x128xf32> to vector<1xf32>
    %25 = vector.shape_cast %24 : vector<1xf32> to vector<1x1x1xf32>
    %26 = vector.extract %25[0, 0, 0] : f32 from vector<1x1x1xf32>
    %27 = vector.broadcast %26 : f32 to vector<1x1xf32>
    %cst_9 = arith.constant 1.000000e-30 : f32
    %28 = vector.broadcast %cst_9 : f32 to vector<1x1xf32>
    %29 = arith.maximumf %27, %28 : vector<1x1xf32>
    %cst_10 = arith.constant 1.000000e+00 : f32
    %30 = vector.broadcast %cst_10 : f32 to vector<1x1xf32>
    %31 = arith.divf %30, %29 : vector<1x1xf32>
    %32 = math.log %31 : vector<1x1xf32>
    %cst_11 = arith.constant 5.000000e-01 : f32
    %33 = vector.broadcast %cst_11 : f32 to vector<1x1xf32>
    %34 = arith.mulf %33, %32 : vector<1x1xf32>
    %35 = arith.subf %18, %34 : vector<1x1xf32>
    %36 = vector.broadcast %31 : vector<1x1xf32> to vector<128x128xf32>
    %37 = arith.mulf %21, %36 : vector<128x128xf32>
    %cst_12 = arith.constant dense<0.000000e+00> : vector<128x128xf32>
    %38 = tpu.matmul %37, %37, %cst_12 {dimension_numbers = #tpu.dot_dimension_numbers<[1], [0], [0], [1], [0, 0, 1, 1], [], []>} : vector<128x128xf32>, vector<128x128xf32>, vector<128x128xf32> -> vector<128x128xf32>
    %39 = math.absf %38 : vector<128x128xf32>
    %40 = vector.shape_cast %39 : vector<128x128xf32> to vector<1x128x128xf32>
    %cst_13 = arith.constant dense<0xFF800000> : vector<1xf32>
    %41 = vector.multi_reduction <maximumf>, %40, %cst_13 [1, 2] : vector<1x128x128xf32> to vector<1xf32>
    %42 = vector.shape_cast %41 : vector<1xf32> to vector<1x1x1xf32>
    %43 = vector.extract %42[0, 0, 0] : f32 from vector<1x1x1xf32>
    %44 = vector.broadcast %43 : f32 to vector<1x1xf32>
    %cst_14 = arith.constant 1.000000e-30 : f32
    %45 = vector.broadcast %cst_14 : f32 to vector<1x1xf32>
    %46 = arith.maximumf %44, %45 : vector<1x1xf32>
    %cst_15 = arith.constant 1.000000e+00 : f32
    %47 = vector.broadcast %cst_15 : f32 to vector<1x1xf32>
    %48 = arith.divf %47, %46 : vector<1x1xf32>
    %49 = math.log %48 : vector<1x1xf32>
    %cst_16 = arith.constant 2.500000e-01 : f32
    %50 = vector.broadcast %cst_16 : f32 to vector<1x1xf32>
    %51 = arith.mulf %50, %49 : vector<1x1xf32>
    %52 = arith.subf %35, %51 : vector<1x1xf32>
    %53 = vector.broadcast %48 : vector<1x1xf32> to vector<128x128xf32>
    %54 = arith.mulf %38, %53 : vector<128x128xf32>
    %cst_17 = arith.constant dense<0.000000e+00> : vector<128x128xf32>
    %55 = tpu.matmul %54, %54, %cst_17 {dimension_numbers = #tpu.dot_dimension_numbers<[1], [0], [0], [1], [0, 0, 1, 1], [], []>} : vector<128x128xf32>, vector<128x128xf32>, vector<128x128xf32> -> vector<128x128xf32>
    %56 = math.absf %55 : vector<128x128xf32>
    %57 = vector.shape_cast %56 : vector<128x128xf32> to vector<1x128x128xf32>
    %cst_18 = arith.constant dense<0xFF800000> : vector<1xf32>
    %58 = vector.multi_reduction <maximumf>, %57, %cst_18 [1, 2] : vector<1x128x128xf32> to vector<1xf32>
    %59 = vector.shape_cast %58 : vector<1xf32> to vector<1x1x1xf32>
    %60 = vector.extract %59[0, 0, 0] : f32 from vector<1x1x1xf32>
    %61 = vector.broadcast %60 : f32 to vector<1x1xf32>
    %cst_19 = arith.constant 1.000000e-30 : f32
    %62 = vector.broadcast %cst_19 : f32 to vector<1x1xf32>
    %63 = arith.maximumf %61, %62 : vector<1x1xf32>
    %cst_20 = arith.constant 1.000000e+00 : f32
    %64 = vector.broadcast %cst_20 : f32 to vector<1x1xf32>
    %65 = arith.divf %64, %63 : vector<1x1xf32>
    %66 = math.log %65 : vector<1x1xf32>
    %cst_21 = arith.constant 1.250000e-01 : f32
    %67 = vector.broadcast %cst_21 : f32 to vector<1x1xf32>
    %68 = arith.mulf %67, %66 : vector<1x1xf32>
    %69 = arith.subf %52, %68 : vector<1x1xf32>
    %70 = vector.broadcast %65 : vector<1x1xf32> to vector<128x128xf32>
    %71 = arith.mulf %55, %70 : vector<128x128xf32>
    %cst_22 = arith.constant dense<0.000000e+00> : vector<128x128xf32>
    %72 = tpu.matmul %71, %71, %cst_22 {dimension_numbers = #tpu.dot_dimension_numbers<[1], [0], [0], [1], [0, 0, 1, 1], [], []>} : vector<128x128xf32>, vector<128x128xf32>, vector<128x128xf32> -> vector<128x128xf32>
    %73 = math.absf %72 : vector<128x128xf32>
    %74 = vector.shape_cast %73 : vector<128x128xf32> to vector<1x128x128xf32>
    %cst_23 = arith.constant dense<0xFF800000> : vector<1xf32>
    %75 = vector.multi_reduction <maximumf>, %74, %cst_23 [1, 2] : vector<1x128x128xf32> to vector<1xf32>
    %76 = vector.shape_cast %75 : vector<1xf32> to vector<1x1x1xf32>
    %77 = vector.extract %76[0, 0, 0] : f32 from vector<1x1x1xf32>
    %78 = vector.broadcast %77 : f32 to vector<1x1xf32>
    %cst_24 = arith.constant 1.000000e-30 : f32
    %79 = vector.broadcast %cst_24 : f32 to vector<1x1xf32>
    %80 = arith.maximumf %78, %79 : vector<1x1xf32>
    %cst_25 = arith.constant 1.000000e+00 : f32
    %81 = vector.broadcast %cst_25 : f32 to vector<1x1xf32>
    %82 = arith.divf %81, %80 : vector<1x1xf32>
    %83 = math.log %82 : vector<1x1xf32>
    %cst_26 = arith.constant 6.250000e-02 : f32
    %84 = vector.broadcast %cst_26 : f32 to vector<1x1xf32>
    %85 = arith.mulf %84, %83 : vector<1x1xf32>
    %86 = arith.subf %69, %85 : vector<1x1xf32>
    %87 = vector.broadcast %82 : vector<1x1xf32> to vector<128x128xf32>
    %88 = arith.mulf %72, %87 : vector<128x128xf32>
    %cst_27 = arith.constant dense<0.000000e+00> : vector<128x128xf32>
    %89 = tpu.matmul %88, %88, %cst_27 {dimension_numbers = #tpu.dot_dimension_numbers<[1], [0], [0], [1], [0, 0, 1, 1], [], []>} : vector<128x128xf32>, vector<128x128xf32>, vector<128x128xf32> -> vector<128x128xf32>
    %90 = math.absf %89 : vector<128x128xf32>
    %91 = vector.shape_cast %90 : vector<128x128xf32> to vector<1x128x128xf32>
    %cst_28 = arith.constant dense<0xFF800000> : vector<1xf32>
    %92 = vector.multi_reduction <maximumf>, %91, %cst_28 [1, 2] : vector<1x128x128xf32> to vector<1xf32>
    %93 = vector.shape_cast %92 : vector<1xf32> to vector<1x1x1xf32>
    %94 = vector.extract %93[0, 0, 0] : f32 from vector<1x1x1xf32>
    %95 = vector.broadcast %94 : f32 to vector<1x1xf32>
    %cst_29 = arith.constant 1.000000e-30 : f32
    %96 = vector.broadcast %cst_29 : f32 to vector<1x1xf32>
    %97 = arith.maximumf %95, %96 : vector<1x1xf32>
    %cst_30 = arith.constant 1.000000e+00 : f32
    %98 = vector.broadcast %cst_30 : f32 to vector<1x1xf32>
    %99 = arith.divf %98, %97 : vector<1x1xf32>
    %100 = math.log %99 : vector<1x1xf32>
    %cst_31 = arith.constant 3.125000e-02 : f32
    %101 = vector.broadcast %cst_31 : f32 to vector<1x1xf32>
    %102 = arith.mulf %101, %100 : vector<1x1xf32>
    %103 = arith.subf %86, %102 : vector<1x1xf32>
    %104 = vector.broadcast %99 : vector<1x1xf32> to vector<128x128xf32>
    %105 = arith.mulf %89, %104 : vector<128x128xf32>
    %cst_32 = arith.constant dense<0.000000e+00> : vector<128x128xf32>
    %106 = tpu.matmul %105, %105, %cst_32 {dimension_numbers = #tpu.dot_dimension_numbers<[1], [0], [0], [1], [0, 0, 1, 1], [], []>} : vector<128x128xf32>, vector<128x128xf32>, vector<128x128xf32> -> vector<128x128xf32>
    %107 = math.absf %106 : vector<128x128xf32>
    %108 = vector.shape_cast %107 : vector<128x128xf32> to vector<1x128x128xf32>
    %cst_33 = arith.constant dense<0xFF800000> : vector<1xf32>
    %109 = vector.multi_reduction <maximumf>, %108, %cst_33 [1, 2] : vector<1x128x128xf32> to vector<1xf32>
    %110 = vector.shape_cast %109 : vector<1xf32> to vector<1x1x1xf32>
    %111 = vector.extract %110[0, 0, 0] : f32 from vector<1x1x1xf32>
    %112 = vector.broadcast %111 : f32 to vector<1x1xf32>
    %cst_34 = arith.constant 1.000000e-30 : f32
    %113 = vector.broadcast %cst_34 : f32 to vector<1x1xf32>
    %114 = arith.maximumf %112, %113 : vector<1x1xf32>
    %cst_35 = arith.constant 1.000000e+00 : f32
    %115 = vector.broadcast %cst_35 : f32 to vector<1x1xf32>
    %116 = arith.divf %115, %114 : vector<1x1xf32>
    %117 = math.log %116 : vector<1x1xf32>
    %cst_36 = arith.constant 1.562500e-02 : f32
    %118 = vector.broadcast %cst_36 : f32 to vector<1x1xf32>
    %119 = arith.mulf %118, %117 : vector<1x1xf32>
    %120 = arith.subf %103, %119 : vector<1x1xf32>
    %121 = vector.broadcast %116 : vector<1x1xf32> to vector<128x128xf32>
    %122 = arith.mulf %106, %121 : vector<128x128xf32>
    %cst_37 = arith.constant dense<0.000000e+00> : vector<128x128xf32>
    %123 = tpu.matmul %122, %122, %cst_37 {dimension_numbers = #tpu.dot_dimension_numbers<[1], [0], [0], [1], [0, 0, 1, 1], [], []>} : vector<128x128xf32>, vector<128x128xf32>, vector<128x128xf32> -> vector<128x128xf32>
    %124 = math.absf %123 : vector<128x128xf32>
    %125 = vector.shape_cast %124 : vector<128x128xf32> to vector<1x128x128xf32>
    %cst_38 = arith.constant dense<0xFF800000> : vector<1xf32>
    %126 = vector.multi_reduction <maximumf>, %125, %cst_38 [1, 2] : vector<1x128x128xf32> to vector<1xf32>
    %127 = vector.shape_cast %126 : vector<1xf32> to vector<1x1x1xf32>
    %128 = vector.extract %127[0, 0, 0] : f32 from vector<1x1x1xf32>
    %129 = vector.broadcast %128 : f32 to vector<1x1xf32>
    %cst_39 = arith.constant 1.000000e-30 : f32
    %130 = vector.broadcast %cst_39 : f32 to vector<1x1xf32>
    %131 = arith.maximumf %129, %130 : vector<1x1xf32>
    %cst_40 = arith.constant 1.000000e+00 : f32
    %132 = vector.broadcast %cst_40 : f32 to vector<1x1xf32>
    %133 = arith.divf %132, %131 : vector<1x1xf32>
    %134 = math.log %133 : vector<1x1xf32>
    %cst_41 = arith.constant 7.812500e-03 : f32
    %135 = vector.broadcast %cst_41 : f32 to vector<1x1xf32>
    %136 = arith.mulf %135, %134 : vector<1x1xf32>
    %137 = arith.subf %120, %136 : vector<1x1xf32>
    %138 = vector.broadcast %133 : vector<1x1xf32> to vector<128x128xf32>
    %139 = arith.mulf %123, %138 : vector<128x128xf32>
    %cst_42 = arith.constant dense<0.000000e+00> : vector<128x128xf32>
    %140 = tpu.matmul %139, %139, %cst_42 {dimension_numbers = #tpu.dot_dimension_numbers<[1], [0], [0], [1], [0, 0, 1, 1], [], []>} : vector<128x128xf32>, vector<128x128xf32>, vector<128x128xf32> -> vector<128x128xf32>
    %141 = math.absf %140 : vector<128x128xf32>
    %142 = vector.shape_cast %141 : vector<128x128xf32> to vector<1x128x128xf32>
    %cst_43 = arith.constant dense<0xFF800000> : vector<1xf32>
    %143 = vector.multi_reduction <maximumf>, %142, %cst_43 [1, 2] : vector<1x128x128xf32> to vector<1xf32>
    %144 = vector.shape_cast %143 : vector<1xf32> to vector<1x1x1xf32>
    %145 = vector.extract %144[0, 0, 0] : f32 from vector<1x1x1xf32>
    %146 = vector.broadcast %145 : f32 to vector<1x1xf32>
    %cst_44 = arith.constant 1.000000e-30 : f32
    %147 = vector.broadcast %cst_44 : f32 to vector<1x1xf32>
    %148 = arith.maximumf %146, %147 : vector<1x1xf32>
    %cst_45 = arith.constant 1.000000e+00 : f32
    %149 = vector.broadcast %cst_45 : f32 to vector<1x1xf32>
    %150 = arith.divf %149, %148 : vector<1x1xf32>
    %151 = math.log %150 : vector<1x1xf32>
    %cst_46 = arith.constant 3.906250e-03 : f32
    %152 = vector.broadcast %cst_46 : f32 to vector<1x1xf32>
    %153 = arith.mulf %152, %151 : vector<1x1xf32>
    %154 = arith.subf %137, %153 : vector<1x1xf32>
    %155 = vector.broadcast %150 : vector<1x1xf32> to vector<128x128xf32>
    %156 = arith.mulf %140, %155 : vector<128x128xf32>
    %cst_47 = arith.constant dense<0.000000e+00> : vector<128x128xf32>
    %157 = tpu.matmul %156, %156, %cst_47 {dimension_numbers = #tpu.dot_dimension_numbers<[1], [0], [0], [1], [0, 0, 1, 1], [], []>} : vector<128x128xf32>, vector<128x128xf32>, vector<128x128xf32> -> vector<128x128xf32>
    %158 = math.absf %157 : vector<128x128xf32>
    %159 = vector.shape_cast %158 : vector<128x128xf32> to vector<1x128x128xf32>
    %cst_48 = arith.constant dense<0xFF800000> : vector<1xf32>
    %160 = vector.multi_reduction <maximumf>, %159, %cst_48 [1, 2] : vector<1x128x128xf32> to vector<1xf32>
    %161 = vector.shape_cast %160 : vector<1xf32> to vector<1x1x1xf32>
    %162 = vector.extract %161[0, 0, 0] : f32 from vector<1x1x1xf32>
    %163 = vector.broadcast %162 : f32 to vector<1x1xf32>
    %cst_49 = arith.constant 1.000000e-30 : f32
    %164 = vector.broadcast %cst_49 : f32 to vector<1x1xf32>
    %165 = arith.maximumf %163, %164 : vector<1x1xf32>
    %cst_50 = arith.constant 1.000000e+00 : f32
    %166 = vector.broadcast %cst_50 : f32 to vector<1x1xf32>
    %167 = arith.divf %166, %165 : vector<1x1xf32>
    %168 = math.log %167 : vector<1x1xf32>
    %cst_51 = arith.constant 0.001953125 : f32
    %169 = vector.broadcast %cst_51 : f32 to vector<1x1xf32>
    %170 = arith.mulf %169, %168 : vector<1x1xf32>
    %171 = arith.subf %154, %170 : vector<1x1xf32>
    %172 = vector.broadcast %167 : vector<1x1xf32> to vector<128x128xf32>
    %173 = arith.mulf %157, %172 : vector<128x128xf32>
    %cst_52 = arith.constant dense<0.000000e+00> : vector<128x128xf32>
    %174 = tpu.matmul %173, %173, %cst_52 {dimension_numbers = #tpu.dot_dimension_numbers<[1], [0], [0], [1], [0, 0, 1, 1], [], []>} : vector<128x128xf32>, vector<128x128xf32>, vector<128x128xf32> -> vector<128x128xf32>
    %175 = arith.mulf %174, %174 : vector<128x128xf32>
    %176 = vector.shape_cast %175 : vector<128x128xf32> to vector<1x128x128xf32>
    %cst_53 = arith.constant dense<0.000000e+00> : vector<1xf32>
    %177 = vector.multi_reduction <add>, %176, %cst_53 [1, 2] : vector<1x128x128xf32> to vector<1xf32>
    %178 = vector.shape_cast %177 : vector<1xf32> to vector<1x1x1xf32>
    %179 = vector.extract %178[0, 0, 0] : f32 from vector<1x1x1xf32>
    %180 = vector.broadcast %179 : f32 to vector<1x1xf32>
    %cst_54 = arith.constant 9.99999935E-39 : f32
    %181 = vector.broadcast %cst_54 : f32 to vector<1x1xf32>
    %182 = arith.addf %180, %181 : vector<1x1xf32>
    %183 = math.log %182 : vector<1x1xf32>
    %cst_55 = arith.constant 4.8828125E-4 : f32
    %184 = vector.broadcast %cst_55 : f32 to vector<1x1xf32>
    %185 = arith.mulf %184, %183 : vector<1x1xf32>
    %186 = arith.addf %171, %185 : vector<1x1xf32>
    %187 = math.exp %186 : vector<1x1xf32>
    %c0_56 = arith.constant 0 : index
    %c0_57 = arith.constant 0 : index
    %188 = vector.load %arg2[%c0_56, %c0_57] : memref<1x1xf32, #tpu.memory_space<vmem>>, vector<1x1xf32>
    tpu.vector_store %arg2[%c0_56, %c0_57], %187 {strides = array<i32>} : memref<1x1xf32, #tpu.memory_space<vmem>>, vector<1x1xf32>,
    return
  }
}

</mosaic_0001>

<bundles_post_ra>
// kernel: _subcircuit_instability.1
= control target key start
LH: loop header
LB: loop body
LE: loop exit
PB: predicated region body
PF: predicated region fallthrough
CT: control target
= control target key end

     0   :  { %v3265_v2 = vmov 0   ;;  %s3933_s0 = inlined_call_operand.vmem [shape: f32[128,128], index: 0, kind: input, shape index: {}]   ;;  %s3934_s1 = inlined_call_operand.vmem [shape: f32[128,1], index: 1, kind: input, shape index: {}]   ;;  %s3935_s2 = inlined_call_operand.hbm [shape: f32[1,1], index: 2, kind: output, shape index: {}]  }
   0x1   :  { %v14_v0 = vld [vmem:[%s3934_s1 + $0x10] sm:$0xff]  ;;  %v12_v1 = vld [vmem:[%s3934_s1] sm:$0xff]  ;;  %3198 = vset.pattern.permute.xlu1 %v3265_v2  ;;  %3197 = vset.pattern.permute.xlu0 %v3265_v2  ;;  %v15_v3 = vld [vmem:[%s3934_s1 + $0x18] sm:$0xff] }
   0x2   :  { %56 = vperm.xlu1 %3198, %v14_v0   ;;  %46 = vperm.xlu0 %3197, %v12_v1   ;;  %v13_v4 = vld [vmem:[%s3934_s1 + $0x8] sm:$0xff]  ;;  %v16_v6 = vld [vmem:[%s3934_s1 + $0x20] sm:$0xff] }
   0x3   :  { %v17_v5 = vld [vmem:[%s3934_s1 + $0x28] sm:$0xff] }
   0x6   :  { %61 = vperm.xlu1 %3198, %v15_v3   ;;  %51 = vperm.xlu0 %3197, %v13_v4  }
   0x7   :  { %7 = vsyncpa [#allocation3], 0  ;;  %v19_v7 = vld [vmem:[%s3934_s1 + $0x38] sm:$0xff]  ;;  %v18_v8 = vld [vmem:[%s3934_s1 + $0x30] sm:$0xff]  ;;  %s3266_s25 = smov [#allocation2]   ;;  %vm2277_vm0 = vcmask 0  }
   0x8   :  { %v21_v9 = vld [vmem:[%s3934_s1 + $0x48] sm:$0xff]  ;;  %v20_v10 = vld [vmem:[%s3934_s1 + $0x40] sm:$0xff]  ;;  %v23_v11 = vld [vmem:[%s3934_s1 + $0x58] sm:$0xff]  ;;  %s2285_s26 = sshll.u32 %s3266_s25, 4  ;;  %s2286_s26 = int_to_ptr.vmem [resolvable:$true] %s2285_s26 }
   0x9   :  { %v22_v12 = vld [vmem:[%s3934_s1 + $0x50] sm:$0xff]  ;;  %v25_v13 = vld [vmem:[%s3934_s1 + $0x68] sm:$0xff]  ;;  %v24_v14 = vld [vmem:[%s3934_s1 + $0x60] sm:$0xff]  ;;  %s3243_s27 = scalar_lea.vmem %s2286_s26, 16  ;;  %s3247_s28 = scalar_lea.vmem %s2286_s26, 32 }
   0xa   :  { %71 = vperm.xlu1 %3198, %v17_v5   ;;  %66 = vperm.xlu0 %3197, %v16_v6   ;;  %v27_v15 = vld [vmem:[%s3934_s1 + $0x78] sm:$0xff]  ;;  %v26_v16 = vld [vmem:[%s3934_s1 + $0x70] sm:$0xff]  ;;  %v28_v26 = vld [vmem:[%s3933_s0] sm:$0xff]  ;;  %p3244_p0 = scmp.ne.s32.totalorder %s2286_s26, %s3243_s27  ;;  %p3248_p1 = scmp.lt.s32.totalorder %s2286_s26, %s2286_s26 }
   0xb   :  { %v30_v25 = vld [vmem:[%s3933_s0 + $0x10] sm:$0xff]  ;;  %v33_v27 = vld [vmem:[%s3933_s0 + $0x28] sm:$0xff]  ;;  %v32_v28 = vld [vmem:[%s3933_s0 + $0x20] sm:$0xff]  ;;  %p3249_p2 = scmp.lt.s32.totalorder %s3247_s28, %s3243_s27 }
   0xc   :  { %v29_v31 = vld [vmem:[%s3933_s0 + $0x8] sm:$0xff]  ;;  %v35_v32 = vld [vmem:[%s3933_s0 + $0x38] sm:$0xff]  ;;  %v34_v33 = vld [vmem:[%s3933_s0 + $0x30] sm:$0xff] }
   0xd   :  { %v37_v35 = vld [vmem:[%s3933_s0 + $0x48] sm:$0xff]  ;;  %v36_v36 = vld [vmem:[%s3933_s0 + $0x40] sm:$0xff]  ;;  %v31_v38 = vld [vmem:[%s3933_s0 + $0x18] sm:$0xff]  ;;  %p3250_p3 = por %p3249_p2, %p3248_p1 }
   0xe   :  { %81 = vperm.xlu1 %3198, %v19_v7   ;;  %76 = vperm.xlu0 %3197, %v18_v8   ;;  %v39_v41 = vld [vmem:[%s3933_s0 + $0x58] sm:$0xff]  ;;  %v38_v42 = vld [vmem:[%s3933_s0 + $0x50] sm:$0xff]  ;;  %v41_v54 = vld [vmem:[%s3933_s0 + $0x68] sm:$0xff] }
   0xf   :  { %v40_v55 = vld [vmem:[%s3933_s0 + $0x60] sm:$0xff]  ;;  %v43_v4 = vld [vmem:[%s3933_s0 + $0x78] sm:$0xff]  ;;  %v42_v5 = vld [vmem:[%s3933_s0 + $0x70] sm:$0xff]  ;;  %p3251_p4 = pnand %p3250_p3, %p3244_p0 }
  0x12   :  { %91 = vperm.xlu1 %3198, %v21_v9   ;;  %86 = vperm.xlu0 %3197, %v20_v10  }
  0x16   :  { %101 = vperm.xlu1 %3198, %v23_v11   ;;  %96 = vperm.xlu0 %3197, %v22_v12  }
  0x1a   :  { %111 = vperm.xlu1 %3198, %v25_v13   ;;  %106 = vperm.xlu0 %3197, %v24_v14  }
  0x1e   :  { %121 = vperm.xlu1 %3198, %v27_v15   ;;  %116 = vperm.xlu0 %3197, %v26_v16  }
  0x7d   :  { %v57_v17 = vpop.permute.xlu1 %56  ;;  %v47_v18 = vpop.permute.xlu0 %46 }
  0x7e   :  { %v3351_v34 = vmul.f32 %v57_v17, %v30_v25  ;;  %v3359_v37 = vmul.f32 %v47_v18, %v28_v26 }
  0x80   :  { %v142_v50 = vand.u32 2147483647, %v3351_v34  ;;  %v140_v56 = vand.u32 2147483647, %v3359_v37 }
  0x81   :  { %v62_v19 = vpop.permute.xlu1 %61  ;;  %v52_v20 = vpop.permute.xlu0 %51 }
  0x82   :  { %v3374_v43 = vmul.f32 %v52_v20, %v29_v31  ;;  %v3385_v51 = vmul.f32 %v62_v19, %v31_v38 }
  0x84   :  { %v141_v59 = vand.u32 2147483647, %v3374_v43  ;;  %v143_v6 = vand.u32 2147483647, %v3385_v51 }
  0x85   :  { %v72_v21 = vpop.permute.xlu1 %71  ;;  %v67_v22 = vpop.permute.xlu0 %66 }
  0x86   :  { %v3364_v39 = vmul.f32 %v72_v21, %v33_v27  ;;  %v3366_v40 = vmul.f32 %v67_v22, %v32_v28 }
  0x88   :  { %v145_v57 = vand.u32 2147483647, %v3364_v39  ;;  %v144_v58 = vand.u32 2147483647, %v3366_v40 }
  0x89   :  { %v82_v23 = vpop.permute.xlu1 %81  ;;  %v77_v24 = vpop.permute.xlu0 %76 }
  0x8a   :  { %v3376_v44 = vmul.f32 %v82_v23, %v35_v32  ;;  %v3378_v45 = vmul.f32 %v77_v24, %v34_v33  ;;  %v157_v9 = vmax.f32.f32 %v141_v59, %v145_v57  ;;  %v156_v10 = vmax.f32.f32 %v140_v56, %v144_v58 }
  0x8c   :  { %v147_v60 = vand.u32 2147483647, %v3376_v44  ;;  %v146_v61 = vand.u32 2147483647, %v3378_v45 }
  0x8d   :  { %v92_v29 = vpop.permute.xlu1 %91  ;;  %v87_v30 = vpop.permute.xlu0 %86 }
  0x8e   :  { %v3380_v48 = vmul.f32 %v92_v29, %v37_v35  ;;  %v3382_v49 = vmul.f32 %v87_v30, %v36_v36  ;;  %v159_v13 = vmax.f32.f32 %v143_v6, %v147_v60  ;;  %v158_v14 = vmax.f32.f32 %v142_v50, %v146_v61 }
  0x90   :  { %v149_v0 = vand.u32 2147483647, %v3380_v48  ;;  %v148_v1 = vand.u32 2147483647, %v3382_v49 }
  0x91   :  { %v102_v46 = vpop.permute.xlu1 %101  ;;  %v97_v47 = vpop.permute.xlu0 %96 }
  0x92   :  { %v3387_v52 = vmul.f32 %v102_v46, %v39_v41  ;;  %v3389_v53 = vmul.f32 %v97_v47, %v38_v42  ;;  %v161_v17 = vmax.f32.f32 %v157_v9, %v149_v0  ;;  %v160_v18 = vmax.f32.f32 %v156_v10, %v148_v1 }
  0x94   :  { %v151_v7 = vand.u32 2147483647, %v3387_v52  ;;  %v150_v8 = vand.u32 2147483647, %v3389_v53 }
  0x95   :  { %v112_v62 = vpop.permute.xlu1 %111  ;;  %v107_v63 = vpop.permute.xlu0 %106 }
  0x96   :  { %v137_v2 = vmul.f32 %v112_v62, %v41_v54  ;;  %v136_v3 = vmul.f32 %v107_v63, %v40_v55  ;;  %v163_v21 = vmax.f32.f32 %v159_v13, %v151_v7  ;;  %v162_v22 = vmax.f32.f32 %v158_v14, %v150_v8 }
  0x98   :  { %v153_v11 = vand.u32 2147483647, %v137_v2  ;;  %v152_v12 = vand.u32 2147483647, %v136_v3 }
  0x99   :  { %v122_v15 = vpop.permute.xlu1 %121  ;;  %v117_v16 = vpop.permute.xlu0 %116 }
  0x9a   :  { %v139_v19 = vmul.f32 %v122_v15, %v43_v4  ;;  %v138_v20 = vmul.f32 %v117_v16, %v42_v5  ;;  %v165_v23 = vmax.f32.f32 %v161_v17, %v153_v11  ;;  %v164_v24 = vmax.f32.f32 %v160_v18, %v152_v12 }
  0x9c   :  { %v155_v25 = vand.u32 2147483647, %v139_v19  ;;  %v154_v26 = vand.u32 2147483647, %v138_v20  ;;  %v168_v29 = vmax.f32.f32 %v164_v24, %v165_v23 }
  0x9e   :  { %v167_v27 = vmax.f32.f32 %v163_v21, %v155_v25  ;;  %v166_v28 = vmax.f32.f32 %v162_v22, %v154_v26 }
  0xa0   :  { %v169_v30 = vmax.f32.f32 %v166_v28, %v167_v27 }
  0xa2   :  { %v170_v31 = vmax.f32.f32 %v168_v29, %v169_v30 }
  0xa4   :  { %171 = vmax.xlane.f32.xlu0 %v170_v31 }
 0x12d   :  { %v172_v32 = vpop.xlane.xlu0 %171 }
 0x12e   :  { %v173_v33 = vrot.slane %v172_v32, 4 }
 0x130   :  { %v174_v35 = vmax.f32 %v172_v32, %v173_v33 }
 0x132   :  { %v175_v36 = vrot.slane %v174_v35, 2 }
 0x134   :  { %v176_v38 = vmax.f32 %v174_v35, %v175_v36 }
 0x136   :  { %v177_v41 = vrot.slane %v176_v38, 1 }
 0x138   :  { %v178_v42 = vmax.f32 %v176_v38, %v177_v41 }
 0x13a   :  { %3173 = vpush %v178_v42 }
 0x16b   :  { %s3174_s0 = spop %3173 }
 0x16c   :  { %v180_v46 = vstv %s3174_s0 }
 0x16d   :  { %v181_v47 = vmax.f32 %v180_v46, 1e-30 }
 0x16f   :  { %3199 = vrcp.f32 %v181_v47 }
 0x17c   :  { %v3414_v50 = vpop.eup %3199 }
 0x17d   :  { %v202_v54 = vmul.f32 %v3414_v50, %v139_v19  ;;  %v187_v55 = vmul.f32 %v3414_v50, %v3359_v37  ;;  %v201_v56 = vmul.f32 %v3414_v50, %v138_v20  ;;  %v200_v57 = vmul.f32 %v3414_v50, %v137_v2 }
 0x17e   :  { %v199_v58 = vmul.f32 %v3414_v50, %v136_v3  ;;  %v198_v59 = vmul.f32 %v3414_v50, %v3387_v52  ;;  %v197_v37 = vmul.f32 %v3414_v50, %v3389_v53  ;;  %v196_v60 = vmul.f32 %v3414_v50, %v3380_v48 }
 0x17f   :  { %2613 = vmatprep.subr.mxu0 %v202_v54  ;;  %2645 = vmatprep.mubr.f32.mxu0 %v187_v55  ;;  %v195_v61 = vmul.f32 %v3414_v50, %v3382_v49  ;;  %v194_v52 = vmul.f32 %v3414_v50, %v3376_v44  ;;  %v193_v53 = vmul.f32 %v3414_v50, %v3378_v45 }
 0x180   :  { %2614 = vmatpush3.msra.mxu0 %v202_v54  ;;  %v192_v48 = vmul.f32 %v3414_v50, %v3364_v39  ;;  %v191_v49 = vmul.f32 %v3414_v50, %v3366_v40  ;;  %v190_v44 = vmul.f32 %v3414_v50, %v3385_v51  ;;  %v189_v45 = vmul.f32 %v3414_v50, %v3351_v34 }
 0x181   :  { %2615 = vmatprep.subr.mxu0 %v201_v56  ;;  %v188_v39 = vmul.f32 %v3414_v50, %v3374_v43 }
 0x182   :  { %2616 = vmatpush3.msra.mxu0 %v201_v56 }
 0x183   :  { %2617 = vmatprep.subr.mxu0 %v200_v57 }
 0x184   :  { %2618 = vmatpush3.msra.mxu0 %v200_v57 }
 0x185   :  { %2619 = vmatprep.subr.mxu0 %v199_v58 }
 0x186   :  { %2620 = vmatpush3.msra.mxu0 %v199_v58 }
 0x187   :  { %2621 = vmatprep.subr.mxu0 %v198_v59 }
 0x188   :  { %2622 = vmatpush3.msra.mxu0 %v198_v59 }
 0x189   :  { %2623 = vmatprep.subr.mxu0 %v197_v37 }
 0x18a   :  { %2624 = vmatpush3.msra.mxu0 %v197_v37 }
 0x18b   :  { %2625 = vmatprep.subr.mxu0 %v196_v60 }
 0x18c   :  { %2626 = vmatpush3.msra.mxu0 %v196_v60 }
 0x18d   :  { %2627 = vmatprep.subr.mxu0 %v195_v61 }
 0x18e   :  { %2628 = vmatpush3.msra.mxu0 %v195_v61 }
 0x18f   :  { %2629 = vmatprep.subr.mxu0 %v194_v52 }
 0x190   :  { %2630 = vmatpush3.msra.mxu0 %v194_v52 }
 0x191   :  { %2631 = vmatprep.subr.mxu0 %v193_v53 }
 0x192   :  { %2632 = vmatpush3.msra.mxu0 %v193_v53 }
 0x193   :  { %2633 = vmatprep.subr.mxu0 %v192_v48 }
 0x194   :  { %2634 = vmatpush3.msra.mxu0 %v192_v48 }
 0x195   :  { %2635 = vmatprep.subr.mxu0 %v191_v49 }
 0x196   :  { %2636 = vmatpush3.msra.mxu0 %v191_v49 }
 0x197   :  { %2637 = vmatprep.subr.mxu0 %v190_v44 }
 0x198   :  { %2638 = vmatpush3.msra.mxu0 %v190_v44 }
 0x199   :  { %2639 = vmatprep.subr.mxu0 %v189_v45 }
 0x19a   :  { %2640 = vmatpush3.msra.mxu0 %v189_v45 }
 0x19b   :  { %2641 = vmatprep.subr.mxu0 %v188_v39 }
 0x19c   :  { %2642 = vmatpush3.msra.mxu0 %v188_v39 }
 0x19d   :  { %2643 = vmatprep.subr.mxu0 %v187_v55 }
 0x19e   :  { %2644 = vmatpush3.msra.mxu0 %v187_v55 }
 0x19f   :  { %2646 = vmatmul.mubr.f32.vlgmr.msra.gmra.mxu0 %v188_v39 }
 0x1a0   :  { %2648 = vmatprep.mubr.f32.mxu0 %v189_v45 }
 0x1a3   :  { %2649 = vmatmul.mubr.f32.gmra.mxu0 %v190_v44 }
 0x1a4   :  { %2651 = vmatprep.mubr.f32.mxu0 %v191_v49 }
 0x1a7   :  { %2652 = vmatmul.mubr.f32.gmra.mxu0 %v192_v48 }
 0x1a8   :  { %2654 = vmatprep.mubr.f32.mxu0 %v193_v53 }
 0x1ab   :  { %2655 = vmatmul.mubr.f32.gmra.mxu0 %v194_v52 }
 0x1ac   :  { %2657 = vmatprep.mubr.f32.mxu0 %v195_v61 }
 0x1af   :  { %2658 = vmatmul.mubr.f32.gmra.mxu0 %v196_v60 }
 0x1b0   :  { %2660 = vmatprep.mubr.f32.mxu0 %v197_v37 }
 0x1b3   :  { %2661 = vmatmul.mubr.f32.gmra.mxu0 %v198_v59 }
 0x1b4   :  { %2663 = vmatprep.mubr.f32.mxu0 %v199_v58 }
 0x1b7   :  { %2664 = vmatmul.mubr.f32.gmra.mxu0 %v200_v57 }
 0x1b8   :  { %2666 = vmatprep.mubr.f32.mxu0 %v201_v56 }
 0x1bb   :  { %2667 = vmatmul.mubr.f32.gmra.mxu0 %v202_v54 }
 0x25f   :  { %v3444_v34 = vpop.f32.mrf.mxu0 }
 0x260   :  { %v349_v7 = vand.u32 2147483647, %v3444_v34 }
 0x261   :  { %v269_v40 = vpop.f32.mrf.mxu0 }
 0x262   :  { %v348_v11 = vand.u32 2147483647, %v269_v40 }
 0x263   :  { %v3446_v43 = vpop.f32.mrf.mxu0 }
 0x264   :  { %v351_v14 = vand.u32 2147483647, %v3446_v43 }
 0x265   :  { %v3448_v51 = vpop.f32.mrf.mxu0 }
 0x266   :  { %v350_v15 = vand.u32 2147483647, %v3448_v51 }
 0x267   :  { %v3450_v62 = vpop.f32.mrf.mxu0 }
 0x268   :  { %v353_v8 = vand.u32 2147483647, %v3450_v62 }
 0x269   :  { %v3452_v63 = vpop.f32.mrf.mxu0 }
 0x26a   :  { %v352_v6 = vand.u32 2147483647, %v3452_v63  ;;  %v365_v22 = vmax.f32.f32 %v349_v7, %v353_v8 }
 0x26b   :  { %v3454_v0 = vpop.f32.mrf.mxu0 }
 0x26c   :  { %v355_v9 = vand.u32 2147483647, %v3454_v0  ;;  %v364_v18 = vmax.f32.f32 %v348_v11, %v352_v6 }
 0x26d   :  { %v3456_v1 = vpop.f32.mrf.mxu0 }
 0x26e   :  { %v354_v12 = vand.u32 2147483647, %v3456_v1  ;;  %v367_v23 = vmax.f32.f32 %v351_v14, %v355_v9 }
 0x26f   :  { %v3458_v2 = vpop.f32.mrf.mxu0 }
 0x270   :  { %v357_v16 = vand.u32 2147483647, %v3458_v2  ;;  %v366_v25 = vmax.f32.f32 %v350_v15, %v354_v12 }
 0x271   :  { %v3460_v3 = vpop.f32.mrf.mxu0 }
 0x272   :  { %v356_v13 = vand.u32 2147483647, %v3460_v3  ;;  %v369_v29 = vmax.f32.f32 %v365_v22, %v357_v16 }
 0x273   :  { %v3462_v4 = vpop.f32.mrf.mxu0 }
 0x274   :  { %v359_v19 = vand.u32 2147483647, %v3462_v4  ;;  %v368_v26 = vmax.f32.f32 %v364_v18, %v356_v13 }
 0x275   :  { %v3464_v5 = vpop.f32.mrf.mxu0 }
 0x276   :  { %v358_v20 = vand.u32 2147483647, %v3464_v5  ;;  %v371_v31 = vmax.f32.f32 %v367_v23, %v359_v19 }
 0x277   :  { %v2665_v10 = vpop.f32.mrf.mxu0 }
 0x278   :  { %v361_v27 = vand.u32 2147483647, %v2665_v10  ;;  %v370_v32 = vmax.f32.f32 %v366_v25, %v358_v20 }
 0x279   :  { %v329_v17 = vpop.f32.mrf.mxu0 }
 0x27a   :  { %v360_v21 = vand.u32 2147483647, %v329_v17  ;;  %v373_v36 = vmax.f32.f32 %v369_v29, %v361_v27 }
 0x27b   :  { %v2668_v24 = vpop.f32.mrf.mxu0 }
 0x27c   :  { %v363_v28 = vand.u32 2147483647, %v2668_v24  ;;  %v372_v33 = vmax.f32.f32 %v368_v26, %v360_v21 }
 0x27d   :  { %v339_v30 = vpop.f32.mrf.mxu0 }
 0x27e   :  { %v362_v35 = vand.u32 2147483647, %v339_v30  ;;  %v375_v38 = vmax.f32.f32 %v371_v31, %v363_v28  ;;  %v376_v42 = vmax.f32.f32 %v372_v33, %v373_v36 }
 0x280   :  { %v374_v41 = vmax.f32.f32 %v370_v32, %v362_v35 }
 0x282   :  { %v377_v46 = vmax.f32.f32 %v374_v41, %v375_v38 }
 0x284   :  { %v378_v47 = vmax.f32.f32 %v376_v42, %v377_v46 }
 0x286   :  { %379 = vmax.xlane.f32.xlu1 %v378_v47 }
 0x30f   :  { %v380_v54 = vpop.xlane.xlu1 %379 }
 0x310   :  { %v381_v55 = vrot.slane %v380_v54, 4 }
 0x312   :  { %v382_v56 = vmax.f32 %v380_v54, %v381_v55 }
 0x314   :  { %v383_v57 = vrot.slane %v382_v56, 2 }
 0x316   :  { %v384_v58 = vmax.f32 %v382_v56, %v383_v57 }
 0x318   :  { %v385_v59 = vrot.slane %v384_v58, 1 }
 0x31a   :  { %v386_v37 = vmax.f32 %v384_v58, %v385_v59 }
 0x31c   :  { %3175 = vpush %v386_v37 }
 0x34d   :  { %s3176_s16 = spop %3175 }
 0x34e   :  { %v388_v60 = vstv %s3176_s16 }
 0x34f   :  { %v389_v61 = vmax.f32 %v388_v60, 1e-30 }
 0x351   :  { %3201 = vrcp.f32 %v389_v61 }
 0x352   :  { %3203 = vlog2.f32 %v3414_v50 }
 0x35e   :  { %v3202_v52 = vpop.eup %3201 }
 0x35f   :  { %v3478_v53 = vmul.f32 %v3202_v52, %v2668_v24  ;;  %v396_v48 = vmul.f32 %v3202_v52, %v269_v40  ;;  %v3481_v49 = vmul.f32 %v3202_v52, %v339_v30  ;;  %3205 = vlog2.f32 %v3202_v52  ;;  %v3204_v40 = vpop.eup %3203 }
 0x360   :  { %v409_v44 = vmul.f32 %v3202_v52, %v2665_v10  ;;  %v408_v45 = vmul.f32 %v3202_v52, %v329_v17  ;;  %v407_v50 = vmul.f32 %v3202_v52, %v3462_v4  ;;  %v406_v39 = vmul.f32 %v3202_v52, %v3464_v5 }
 0x361   :  { %2669 = vmatprep.subr.mxu1 %v3478_v53  ;;  %2701 = vmatprep.mubr.f32.mxu1 %v396_v48  ;;  %v405_v6 = vmul.f32 %v3202_v52, %v3458_v2  ;;  %v404_v7 = vmul.f32 %v3202_v52, %v3460_v3  ;;  %v185_v8 = vmul.f32 0.6931472, %v3204_v40  ;;  %v403_v10 = vmul.f32 %v3202_v52, %v3454_v0 }
 0x362   :  { %2670 = vmatpush3.msra.mxu1 %v3478_v53  ;;  %v402_v5 = vmul.f32 %v3202_v52, %v3456_v1  ;;  %v401_v2 = vmul.f32 %v3202_v52, %v3450_v62  ;;  %v400_v3 = vmul.f32 %v3202_v52, %v3452_v63  ;;  %v399_v0 = vmul.f32 %v3202_v52, %v3446_v43 }
 0x363   :  { %2671 = vmatprep.subr.mxu1 %v3481_v49  ;;  %v186_v11 = vsub.f32 0.0, %v185_v8  ;;  %v398_v1 = vmul.f32 %v3202_v52, %v3448_v51  ;;  %v397_v14 = vmul.f32 %v3202_v52, %v3444_v34 }
 0x364   :  { %2672 = vmatpush3.msra.mxu1 %v3481_v49 }
 0x365   :  { %2673 = vmatprep.subr.mxu1 %v409_v44 }
 0x366   :  { %2674 = vmatpush3.msra.mxu1 %v409_v44 }
 0x367   :  { %2675 = vmatprep.subr.mxu1 %v408_v45 }
 0x368   :  { %2676 = vmatpush3.msra.mxu1 %v408_v45 }
 0x369   :  { %2677 = vmatprep.subr.mxu1 %v407_v50 }
 0x36a   :  { %2678 = vmatpush3.msra.mxu1 %v407_v50 }
 0x36b   :  { %2679 = vmatprep.subr.mxu1 %v406_v39 }
 0x36c   :  { %2680 = vmatpush3.msra.mxu1 %v406_v39  ;;  %v3206_v9 = vpop.eup %3205 }
 0x36d   :  { %2681 = vmatprep.subr.mxu1 %v405_v6  ;;  %v393_v4 = vmul.f32 0.6931472, %v3206_v9 }
 0x36e   :  { %2682 = vmatpush3.msra.mxu1 %v405_v6 }
 0x36f   :  { %2683 = vmatprep.subr.mxu1 %v404_v7  ;;  %v394_v12 = vmul.f32 0.5, %v393_v4 }
 0x370   :  { %2684 = vmatpush3.msra.mxu1 %v404_v7 }
 0x371   :  { %2685 = vmatprep.subr.mxu1 %v403_v10  ;;  %v3493_v13 = vsub.f32 %v186_v11, %v394_v12 }
 0x372   :  { %2686 = vmatpush3.msra.mxu1 %v403_v10 }
 0x373   :  { %2687 = vmatprep.subr.mxu1 %v402_v5 }
 0x374   :  { %2688 = vmatpush3.msra.mxu1 %v402_v5 }
 0x375   :  { %2689 = vmatprep.subr.mxu1 %v401_v2 }
 0x376   :  { %2690 = vmatpush3.msra.mxu1 %v401_v2 }
 0x377   :  { %2691 = vmatprep.subr.mxu1 %v400_v3 }
 0x378   :  { %2692 = vmatpush3.msra.mxu1 %v400_v3 }
 0x379   :  { %2693 = vmatprep.subr.mxu1 %v399_v0 }
 0x37a   :  { %2694 = vmatpush3.msra.mxu1 %v399_v0 }
 0x37b   :  { %2695 = vmatprep.subr.mxu1 %v398_v1 }
 0x37c   :  { %2696 = vmatpush3.msra.mxu1 %v398_v1 }
 0x37d   :  { %2697 = vmatprep.subr.mxu1 %v397_v14 }
 0x37e   :  { %2698 = vmatpush3.msra.mxu1 %v397_v14 }
 0x37f   :  { %2699 = vmatprep.subr.mxu1 %v396_v48 }
 0x380   :  { %2700 = vmatpush3.msra.mxu1 %v396_v48 }
 0x381   :  { %2702 = vmatmul.mubr.f32.vlgmr.msra.gmra.mxu1 %v397_v14 }
 0x382   :  { %2704 = vmatprep.mubr.f32.mxu1 %v398_v1 }
 0x385   :  { %2705 = vmatmul.mubr.f32.gmra.mxu1 %v399_v0 }
 0x386   :  { %2707 = vmatprep.mubr.f32.mxu1 %v400_v3 }
 0x389   :  { %2708 = vmatmul.mubr.f32.gmra.mxu1 %v401_v2 }
 0x38a   :  { %2710 = vmatprep.mubr.f32.mxu1 %v402_v5 }
 0x38d   :  { %2711 = vmatmul.mubr.f32.gmra.mxu1 %v403_v10 }
 0x38e   :  { %2713 = vmatprep.mubr.f32.mxu1 %v404_v7 }
 0x391   :  { %2714 = vmatmul.mubr.f32.gmra.mxu1 %v405_v6 }
 0x392   :  { %2716 = vmatprep.mubr.f32.mxu1 %v406_v39 }
 0x395   :  { %2717 = vmatmul.mubr.f32.gmra.mxu1 %v407_v50 }
 0x396   :  { %2719 = vmatprep.mubr.f32.mxu1 %v408_v45 }
 0x399   :  { %2720 = vmatmul.mubr.f32.gmra.mxu1 %v409_v44 }
 0x39a   :  { %2722 = vmatprep.mubr.f32.mxu1 %v3481_v49 }
 0x39d   :  { %2723 = vmatmul.mubr.f32.gmra.mxu1 %v3478_v53 }
 0x441   :  { %v3501_v34 = vpop.f32.mrf.mxu1 }
 0x442   :  { %v558_v23 = vand.u32 2147483647, %v3501_v34 }
 0x443   :  { %v478_v43 = vpop.f32.mrf.mxu1 }
 0x444   :  { %v557_v27 = vand.u32 2147483647, %v478_v43 }
 0x445   :  { %v3503_v51 = vpop.f32.mrf.mxu1 }
 0x446   :  { %v560_v30 = vand.u32 2147483647, %v3503_v51 }
 0x447   :  { %v3505_v62 = vpop.f32.mrf.mxu1 }
 0x448   :  { %v559_v31 = vand.u32 2147483647, %v3505_v62 }
 0x449   :  { %v3507_v63 = vpop.f32.mrf.mxu1 }
 0x44a   :  { %v562_v24 = vand.u32 2147483647, %v3507_v63 }
 0x44b   :  { %v3509_v15 = vpop.f32.mrf.mxu1 }
 0x44c   :  { %v561_v22 = vand.u32 2147483647, %v3509_v15  ;;  %v574_v42 = vmax.f32.f32 %v558_v23, %v562_v24 }
 0x44d   :  { %v3511_v16 = vpop.f32.mrf.mxu1 }
 0x44e   :  { %v564_v25 = vand.u32 2147483647, %v3511_v16  ;;  %v573_v35 = vmax.f32.f32 %v557_v27, %v561_v22 }
 0x44f   :  { %v3513_v17 = vpop.f32.mrf.mxu1 }
 0x450   :  { %v563_v28 = vand.u32 2147483647, %v3513_v17  ;;  %v576_v46 = vmax.f32.f32 %v560_v30, %v564_v25 }
 0x451   :  { %v3515_v18 = vpop.f32.mrf.mxu1 }
 0x452   :  { %v566_v32 = vand.u32 2147483647, %v3515_v18  ;;  %v575_v54 = vmax.f32.f32 %v559_v31, %v563_v28 }
 0x453   :  { %v3517_v19 = vpop.f32.mrf.mxu1 }
 0x454   :  { %v565_v29 = vand.u32 2147483647, %v3517_v19  ;;  %v578_v58 = vmax.f32.f32 %v574_v42, %v566_v32 }
 0x455   :  { %v3519_v20 = vpop.f32.mrf.mxu1 }
 0x456   :  { %v568_v36 = vand.u32 2147483647, %v3519_v20  ;;  %v577_v55 = vmax.f32.f32 %v573_v35, %v565_v29 }
 0x457   :  { %v3521_v21 = vpop.f32.mrf.mxu1 }
 0x458   :  { %v567_v38 = vand.u32 2147483647, %v3521_v21  ;;  %v580_v37 = vmax.f32.f32 %v576_v46, %v568_v36 }
 0x459   :  { %v2721_v26 = vpop.f32.mrf.mxu1 }
 0x45a   :  { %v570_v56 = vand.u32 2147483647, %v2721_v26  ;;  %v579_v60 = vmax.f32.f32 %v575_v54, %v567_v38 }
 0x45b   :  { %v538_v33 = vpop.f32.mrf.mxu1 }
 0x45c   :  { %v569_v41 = vand.u32 2147483647, %v538_v33  ;;  %v582_v53 = vmax.f32.f32 %v578_v58, %v570_v56 }
 0x45d   :  { %v2724_v47 = vpop.f32.mrf.mxu1 }
 0x45e   :  { %v572_v57 = vand.u32 2147483647, %v2724_v47  ;;  %v581_v61 = vmax.f32.f32 %v577_v55, %v569_v41 }
 0x45f   :  { %v548_v59 = vpop.f32.mrf.mxu1 }
 0x460   :  { %v571_v52 = vand.u32 2147483647, %v548_v59  ;;  %v584_v48 = vmax.f32.f32 %v580_v37, %v572_v57  ;;  %v585_v44 = vmax.f32.f32 %v581_v61, %v582_v53 }
 0x462   :  { %v583_v49 = vmax.f32.f32 %v579_v60, %v571_v52 }
 0x464   :  { %v586_v45 = vmax.f32.f32 %v583_v49, %v584_v48 }
 0x466   :  { %v587_v50 = vmax.f32.f32 %v585_v44, %v586_v45 }
 0x468   :  { %588 = vmax.xlane.f32.xlu0 %v587_v50 }
 0x4f1   :  { %v589_v39 = vpop.xlane.xlu0 %588 }
 0x4f2   :  { %v590_v40 = vrot.slane %v589_v39, 4 }
 0x4f4   :  { %v591_v6 = vmax.f32 %v589_v39, %v590_v40 }
 0x4f6   :  { %v592_v7 = vrot.slane %v591_v6, 2 }
 0x4f8   :  { %v593_v8 = vmax.f32 %v591_v6, %v592_v7 }
 0x4fa   :  { %v594_v9 = vrot.slane %v593_v8, 1 }
 0x4fc   :  { %v595_v10 = vmax.f32 %v593_v8, %v594_v9 }
 0x4fe   :  { %3177 = vpush %v595_v10 }
 0x52f   :  { %s3178_s17 = spop %3177 }
 0x530   :  { %v597_v4 = vstv %s3178_s17 }
 0x531   :  { %v598_v5 = vmax.f32 %v597_v4, 1e-30 }
 0x533   :  { %3207 = vrcp.f32 %v598_v5 }
 0x540   :  { %v3208_v11 = vpop.eup %3207 }
 0x541   :  { %v3534_v12 = vmul.f32 %v3208_v11, %v2724_v47  ;;  %v605_v2 = vmul.f32 %v3208_v11, %v478_v43  ;;  %v619_v3 = vmul.f32 %v3208_v11, %v548_v59  ;;  %3209 = vlog2.f32 %v3208_v11 }
 0x542   :  { %v618_v0 = vmul.f32 %v3208_v11, %v2721_v26  ;;  %v617_v1 = vmul.f32 %v3208_v11, %v538_v33  ;;  %v616_v14 = vmul.f32 %v3208_v11, %v3519_v20  ;;  %v615_v43 = vmul.f32 %v3208_v11, %v3521_v21 }
 0x543   :  { %2725 = vmatprep.subr.mxu0 %v3534_v12  ;;  %2757 = vmatprep.mubr.f32.mxu0 %v605_v2  ;;  %v614_v22 = vmul.f32 %v3208_v11, %v3515_v18  ;;  %v613_v23 = vmul.f32 %v3208_v11, %v3517_v19  ;;  %v612_v25 = vmul.f32 %v3208_v11, %v3511_v16 }
 0x544   :  { %2726 = vmatpush3.msra.mxu0 %v3534_v12  ;;  %v611_v20 = vmul.f32 %v3208_v11, %v3513_v17  ;;  %v610_v18 = vmul.f32 %v3208_v11, %v3507_v63  ;;  %v609_v19 = vmul.f32 %v3208_v11, %v3509_v15  ;;  %v608_v16 = vmul.f32 %v3208_v11, %v3503_v51 }
 0x545   :  { %2727 = vmatprep.subr.mxu0 %v619_v3  ;;  %v607_v17 = vmul.f32 %v3208_v11, %v3505_v62  ;;  %v606_v28 = vmul.f32 %v3208_v11, %v3501_v34 }
 0x546   :  { %2728 = vmatpush3.msra.mxu0 %v619_v3 }
 0x547   :  { %2729 = vmatprep.subr.mxu0 %v618_v0 }
 0x548   :  { %2730 = vmatpush3.msra.mxu0 %v618_v0 }
 0x549   :  { %2731 = vmatprep.subr.mxu0 %v617_v1 }
 0x54a   :  { %2732 = vmatpush3.msra.mxu0 %v617_v1 }
 0x54b   :  { %2733 = vmatprep.subr.mxu0 %v616_v14 }
 0x54c   :  { %2734 = vmatpush3.msra.mxu0 %v616_v14 }
 0x54d   :  { %2735 = vmatprep.subr.mxu0 %v615_v43 }
 0x54e   :  { %2736 = vmatpush3.msra.mxu0 %v615_v43  ;;  %v3210_v24 = vpop.eup %3209 }
 0x54f   :  { %2737 = vmatprep.subr.mxu0 %v614_v22  ;;  %v602_v26 = vmul.f32 0.6931472, %v3210_v24 }
 0x550   :  { %2738 = vmatpush3.msra.mxu0 %v614_v22 }
 0x551   :  { %2739 = vmatprep.subr.mxu0 %v613_v23  ;;  %v3544_v27 = vmul.f32 0.25, %v602_v26 }
 0x552   :  { %2740 = vmatpush3.msra.mxu0 %v613_v23 }
 0x553   :  { %2741 = vmatprep.subr.mxu0 %v612_v25  ;;  %v604_v21 = vsub.f32 %v3493_v13, %v3544_v27 }
 0x554   :  { %2742 = vmatpush3.msra.mxu0 %v612_v25 }
 0x555   :  { %2743 = vmatprep.subr.mxu0 %v611_v20 }
 0x556   :  { %2744 = vmatpush3.msra.mxu0 %v611_v20 }
 0x557   :  { %2745 = vmatprep.subr.mxu0 %v610_v18 }
 0x558   :  { %2746 = vmatpush3.msra.mxu0 %v610_v18 }
 0x559   :  { %2747 = vmatprep.subr.mxu0 %v609_v19 }
 0x55a   :  { %2748 = vmatpush3.msra.mxu0 %v609_v19 }
 0x55b   :  { %2749 = vmatprep.subr.mxu0 %v608_v16 }
 0x55c   :  { %2750 = vmatpush3.msra.mxu0 %v608_v16 }
 0x55d   :  { %2751 = vmatprep.subr.mxu0 %v607_v17 }
 0x55e   :  { %2752 = vmatpush3.msra.mxu0 %v607_v17 }
 0x55f   :  { %2753 = vmatprep.subr.mxu0 %v606_v28 }
 0x560   :  { %2754 = vmatpush3.msra.mxu0 %v606_v28 }
 0x561   :  { %2755 = vmatprep.subr.mxu0 %v605_v2 }
 0x562   :  { %2756 = vmatpush3.msra.mxu0 %v605_v2 }
 0x563   :  { %2758 = vmatmul.mubr.f32.vlgmr.msra.gmra.mxu0 %v606_v28 }
 0x564   :  { %2760 = vmatprep.mubr.f32.mxu0 %v607_v17 }
 0x567   :  { %2761 = vmatmul.mubr.f32.gmra.mxu0 %v608_v16 }
 0x568   :  { %2763 = vmatprep.mubr.f32.mxu0 %v609_v19 }
 0x56b   :  { %2764 = vmatmul.mubr.f32.gmra.mxu0 %v610_v18 }
 0x56c   :  { %2766 = vmatprep.mubr.f32.mxu0 %v611_v20 }
 0x56f   :  { %2767 = vmatmul.mubr.f32.gmra.mxu0 %v612_v25 }
 0x570   :  { %2769 = vmatprep.mubr.f32.mxu0 %v613_v23 }
 0x573   :  { %2770 = vmatmul.mubr.f32.gmra.mxu0 %v614_v22 }
 0x574   :  { %2772 = vmatprep.mubr.f32.mxu0 %v615_v43 }
 0x577   :  { %2773 = vmatmul.mubr.f32.gmra.mxu0 %v616_v14 }
 0x578   :  { %2775 = vmatprep.mubr.f32.mxu0 %v617_v1 }
 0x57b   :  { %2776 = vmatmul.mubr.f32.gmra.mxu0 %v618_v0 }
 0x57c   :  { %2778 = vmatprep.mubr.f32.mxu0 %v619_v3 }
 0x57f   :  { %2779 = vmatmul.mubr.f32.gmra.mxu0 %v3534_v12 }
 0x623   :  { %v3554_v34 = vpop.f32.mrf.mxu0 }
 0x624   :  { %v767_v41 = vand.u32 2147483647, %v3554_v34 }
 0x625   :  { %v687_v51 = vpop.f32.mrf.mxu0 }
 0x626   :  { %v766_v54 = vand.u32 2147483647, %v687_v51 }
 0x627   :  { %v3556_v62 = vpop.f32.mrf.mxu0 }
 0x628   :  { %v769_v57 = vand.u32 2147483647, %v3556_v62 }
 0x629   :  { %v3558_v63 = vpop.f32.mrf.mxu0 }
 0x62a   :  { %v768_v58 = vand.u32 2147483647, %v3558_v63 }
 0x62b   :  { %v3560_v15 = vpop.f32.mrf.mxu0 }
 0x62c   :  { %v771_v42 = vand.u32 2147483647, %v3560_v15 }
 0x62d   :  { %v3562_v29 = vpop.f32.mrf.mxu0 }
 0x62e   :  { %v770_v38 = vand.u32 2147483647, %v3562_v29  ;;  %v783_v48 = vmax.f32.f32 %v767_v41, %v771_v42 }
 0x62f   :  { %v3564_v30 = vpop.f32.mrf.mxu0 }
 0x630   :  { %v773_v46 = vand.u32 2147483647, %v3564_v30  ;;  %v782_v60 = vmax.f32.f32 %v766_v54, %v770_v38 }
 0x631   :  { %v3566_v31 = vpop.f32.mrf.mxu0 }
 0x632   :  { %v772_v55 = vand.u32 2147483647, %v3566_v31  ;;  %v785_v49 = vmax.f32.f32 %v769_v57, %v773_v46 }
 0x633   :  { %v3568_v32 = vpop.f32.mrf.mxu0 }
 0x634   :  { %v775_v59 = vand.u32 2147483647, %v3568_v32  ;;  %v784_v45 = vmax.f32.f32 %v768_v58, %v772_v55 }
 0x635   :  { %v3570_v33 = vpop.f32.mrf.mxu0 }
 0x636   :  { %v774_v56 = vand.u32 2147483647, %v3570_v33  ;;  %v787_v6 = vmax.f32.f32 %v783_v48, %v775_v59 }
 0x637   :  { %v3572_v35 = vpop.f32.mrf.mxu0 }
 0x638   :  { %v777_v61 = vand.u32 2147483647, %v3572_v35  ;;  %v786_v50 = vmax.f32.f32 %v782_v60, %v774_v56 }
 0x639   :  { %v3574_v36 = vpop.f32.mrf.mxu0 }
 0x63a   :  { %v776_v52 = vand.u32 2147483647, %v3574_v36  ;;  %v789_v8 = vmax.f32.f32 %v785_v49, %v777_v61 }
 0x63b   :  { %v2777_v47 = vpop.f32.mrf.mxu0 }
 0x63c   :  { %v779_v39 = vand.u32 2147483647, %v2777_v47  ;;  %v788_v9 = vmax.f32.f32 %v784_v45, %v776_v52 }
 0x63d   :  { %v747_v37 = vpop.f32.mrf.mxu0 }
 0x63e   :  { %v778_v53 = vand.u32 2147483647, %v747_v37  ;;  %v791_v5 = vmax.f32.f32 %v787_v6, %v779_v39 }
 0x63f   :  { %v2780_v44 = vpop.f32.mrf.mxu0 }
 0x640   :  { %v781_v40 = vand.u32 2147483647, %v2780_v44  ;;  %v790_v10 = vmax.f32.f32 %v786_v50, %v778_v53 }
 0x641   :  { %v757_v7 = vpop.f32.mrf.mxu0 }
 0x642   :  { %v780_v4 = vand.u32 2147483647, %v757_v7  ;;  %v793_v11 = vmax.f32.f32 %v789_v8, %v781_v40  ;;  %v794_v2 = vmax.f32.f32 %v790_v10, %v791_v5 }
 0x644   :  { %v792_v12 = vmax.f32.f32 %v788_v9, %v780_v4 }
 0x646   :  { %v795_v3 = vmax.f32.f32 %v792_v12, %v793_v11 }
 0x648   :  { %v796_v0 = vmax.f32.f32 %v794_v2, %v795_v3 }
 0x64a   :  { %797 = vmax.xlane.f32.xlu0 %v796_v0 }
 0x6d3   :  { %v798_v1 = vpop.xlane.xlu0 %797 }
 0x6d4   :  { %v799_v14 = vrot.slane %v798_v1, 4 }
 0x6d6   :  { %v800_v43 = vmax.f32 %v798_v1, %v799_v14 }
 0x6d8   :  { %v801_v22 = vrot.slane %v800_v43, 2 }
 0x6da   :  { %v802_v23 = vmax.f32 %v800_v43, %v801_v22 }
 0x6dc   :  { %v803_v24 = vrot.slane %v802_v23, 1 }
 0x6de   :  { %v804_v25 = vmax.f32 %v802_v23, %v803_v24 }
 0x6e0   :  { %3179 = vpush %v804_v25 }
 0x711   :  { %s3180_s1 = spop %3179 }
 0x712   :  { %v806_v26 = vstv %s3180_s1 }
 0x713   :  { %v807_v20 = vmax.f32 %v806_v26, 1e-30 }
 0x715   :  { %3211 = vrcp.f32 %v807_v20 }
 0x722   :  { %v3212_v18 = vpop.eup %3211 }
 0x723   :  { %v3587_v19 = vmul.f32 %v3212_v18, %v2780_v44  ;;  %v814_v16 = vmul.f32 %v3212_v18, %v687_v51  ;;  %v828_v17 = vmul.f32 %v3212_v18, %v757_v7  ;;  %3213 = vlog2.f32 %v3212_v18 }
 0x724   :  { %v827_v28 = vmul.f32 %v3212_v18, %v2777_v47  ;;  %v826_v38 = vmul.f32 %v3212_v18, %v747_v37  ;;  %v825_v41 = vmul.f32 %v3212_v18, %v3572_v35  ;;  %v824_v51 = vmul.f32 %v3212_v18, %v3574_v36 }
 0x725   :  { %2781 = vmatprep.subr.mxu1 %v3587_v19  ;;  %2813 = vmatprep.mubr.f32.mxu1 %v814_v16  ;;  %v823_v42 = vmul.f32 %v3212_v18, %v3568_v32  ;;  %v822_v46 = vmul.f32 %v3212_v18, %v3570_v33  ;;  %v821_v54 = vmul.f32 %v3212_v18, %v3564_v30 }
 0x726   :  { %2782 = vmatpush3.msra.mxu1 %v3587_v19  ;;  %v820_v35 = vmul.f32 %v3212_v18, %v3566_v31  ;;  %v819_v36 = vmul.f32 %v3212_v18, %v3560_v15  ;;  %v818_v33 = vmul.f32 %v3212_v18, %v3562_v29  ;;  %v817_v30 = vmul.f32 %v3212_v18, %v3556_v62 }
 0x727   :  { %2783 = vmatprep.subr.mxu1 %v828_v17  ;;  %v816_v31 = vmul.f32 %v3212_v18, %v3558_v63  ;;  %v815_v15 = vmul.f32 %v3212_v18, %v3554_v34 }
 0x728   :  { %2784 = vmatpush3.msra.mxu1 %v828_v17 }
 0x729   :  { %2785 = vmatprep.subr.mxu1 %v827_v28 }
 0x72a   :  { %2786 = vmatpush3.msra.mxu1 %v827_v28 }
 0x72b   :  { %2787 = vmatprep.subr.mxu1 %v826_v38 }
 0x72c   :  { %2788 = vmatpush3.msra.mxu1 %v826_v38 }
 0x72d   :  { %2789 = vmatprep.subr.mxu1 %v825_v41 }
 0x72e   :  { %2790 = vmatpush3.msra.mxu1 %v825_v41 }
 0x72f   :  { %2791 = vmatprep.subr.mxu1 %v824_v51 }
 0x730   :  { %2792 = vmatpush3.msra.mxu1 %v824_v51  ;;  %v3214_v47 = vpop.eup %3213 }
 0x731   :  { %2793 = vmatprep.subr.mxu1 %v823_v42  ;;  %v811_v55 = vmul.f32 0.6931472, %v3214_v47 }
 0x732   :  { %2794 = vmatpush3.msra.mxu1 %v823_v42 }
 0x733   :  { %2795 = vmatprep.subr.mxu1 %v822_v46  ;;  %v812_v56 = vmul.f32 0.125, %v811_v55 }
 0x734   :  { %2796 = vmatpush3.msra.mxu1 %v822_v46 }
 0x735   :  { %2797 = vmatprep.subr.mxu1 %v821_v54  ;;  %v3601_v32 = vsub.f32 %v604_v21, %v812_v56 }
 0x736   :  { %2798 = vmatpush3.msra.mxu1 %v821_v54 }
 0x737   :  { %2799 = vmatprep.subr.mxu1 %v820_v35 }
 0x738   :  { %2800 = vmatpush3.msra.mxu1 %v820_v35 }
 0x739   :  { %2801 = vmatprep.subr.mxu1 %v819_v36 }
 0x73a   :  { %2802 = vmatpush3.msra.mxu1 %v819_v36 }
 0x73b   :  { %2803 = vmatprep.subr.mxu1 %v818_v33 }
 0x73c   :  { %2804 = vmatpush3.msra.mxu1 %v818_v33 }
 0x73d   :  { %2805 = vmatprep.subr.mxu1 %v817_v30 }
 0x73e   :  { %2806 = vmatpush3.msra.mxu1 %v817_v30 }
 0x73f   :  { %2807 = vmatprep.subr.mxu1 %v816_v31 }
 0x740   :  { %2808 = vmatpush3.msra.mxu1 %v816_v31 }
 0x741   :  { %2809 = vmatprep.subr.mxu1 %v815_v15 }
 0x742   :  { %2810 = vmatpush3.msra.mxu1 %v815_v15 }
 0x743   :  { %2811 = vmatprep.subr.mxu1 %v814_v16 }
 0x744   :  { %2812 = vmatpush3.msra.mxu1 %v814_v16 }
 0x745   :  { %2814 = vmatmul.mubr.f32.vlgmr.msra.gmra.mxu1 %v815_v15 }
 0x746   :  { %2816 = vmatprep.mubr.f32.mxu1 %v816_v31 }
 0x749   :  { %2817 = vmatmul.mubr.f32.gmra.mxu1 %v817_v30 }
 0x74a   :  { %2819 = vmatprep.mubr.f32.mxu1 %v818_v33 }
 0x74d   :  { %2820 = vmatmul.mubr.f32.gmra.mxu1 %v819_v36 }
 0x74e   :  { %2822 = vmatprep.mubr.f32.mxu1 %v820_v35 }
 0x751   :  { %2823 = vmatmul.mubr.f32.gmra.mxu1 %v821_v54 }
 0x752   :  { %2825 = vmatprep.mubr.f32.mxu1 %v822_v46 }
 0x755   :  { %2826 = vmatmul.mubr.f32.gmra.mxu1 %v823_v42 }
 0x756   :  { %2828 = vmatprep.mubr.f32.mxu1 %v824_v51 }
 0x759   :  { %2829 = vmatmul.mubr.f32.gmra.mxu1 %v825_v41 }
 0x75a   :  { %2831 = vmatprep.mubr.f32.mxu1 %v826_v38 }
 0x75d   :  { %2832 = vmatmul.mubr.f32.gmra.mxu1 %v827_v28 }
 0x75e   :  { %2834 = vmatprep.mubr.f32.mxu1 %v828_v17 }
 0x761   :  { %2835 = vmatmul.mubr.f32.gmra.mxu1 %v3587_v19 }
 0x805   :  { %v3608_v13 = vpop.f32.mrf.mxu1 }
 0x806   :  { %v976_v52 = vand.u32 2147483647, %v3608_v13 }
 0x807   :  { %v896_v27 = vpop.f32.mrf.mxu1 }
 0x808   :  { %v975_v44 = vand.u32 2147483647, %v896_v27 }
 0x809   :  { %v3610_v21 = vpop.f32.mrf.mxu1 }
 0x80a   :  { %v978_v39 = vand.u32 2147483647, %v3610_v21 }
 0x80b   :  { %v3612_v34 = vpop.f32.mrf.mxu1 }
 0x80c   :  { %v977_v40 = vand.u32 2147483647, %v3612_v34 }
 0x80d   :  { %v3614_v62 = vpop.f32.mrf.mxu1 }
 0x80e   :  { %v980_v53 = vand.u32 2147483647, %v3614_v62 }
 0x80f   :  { %v3616_v63 = vpop.f32.mrf.mxu1 }
 0x810   :  { %v979_v61 = vand.u32 2147483647, %v3616_v63  ;;  %v992_v5 = vmax.f32.f32 %v976_v52, %v980_v53 }
 0x811   :  { %v3618_v29 = vpop.f32.mrf.mxu1 }
 0x812   :  { %v982_v48 = vand.u32 2147483647, %v3618_v29  ;;  %v991_v8 = vmax.f32.f32 %v975_v44, %v979_v61 }
 0x813   :  { %v3620_v57 = vpop.f32.mrf.mxu1 }
 0x814   :  { %v981_v45 = vand.u32 2147483647, %v3620_v57  ;;  %v994_v11 = vmax.f32.f32 %v978_v39, %v982_v48 }
 0x815   :  { %v3622_v58 = vpop.f32.mrf.mxu1 }
 0x816   :  { %v984_v6 = vand.u32 2147483647, %v3622_v58  ;;  %v993_v2 = vmax.f32.f32 %v977_v40, %v981_v45 }
 0x817   :  { %v3624_v59 = vpop.f32.mrf.mxu1 }
 0x818   :  { %v983_v50 = vand.u32 2147483647, %v3624_v59  ;;  %v996_v14 = vmax.f32.f32 %v992_v5, %v984_v6 }
 0x819   :  { %v3626_v37 = vpop.f32.mrf.mxu1 }
 0x81a   :  { %v986_v9 = vand.u32 2147483647, %v3626_v37  ;;  %v995_v3 = vmax.f32.f32 %v991_v8, %v983_v50 }
 0x81b   :  { %v3628_v60 = vpop.f32.mrf.mxu1 }
 0x81c   :  { %v985_v10 = vand.u32 2147483647, %v3628_v60  ;;  %v998_v22 = vmax.f32.f32 %v994_v11, %v986_v9 }
 0x81d   :  { %v2833_v49 = vpop.f32.mrf.mxu1 }
 0x81e   :  { %v988_v0 = vand.u32 2147483647, %v2833_v49  ;;  %v997_v23 = vmax.f32.f32 %v993_v2, %v985_v10 }
 0x81f   :  { %v956_v7 = vpop.f32.mrf.mxu1 }
 0x820   :  { %v987_v4 = vand.u32 2147483647, %v956_v7  ;;  %v1000_v26 = vmax.f32.f32 %v996_v14, %v988_v0 }
 0x821   :  { %v2836_v12 = vpop.f32.mrf.mxu1 }
 0x822   :  { %v990_v1 = vand.u32 2147483647, %v2836_v12  ;;  %v999_v24 = vmax.f32.f32 %v995_v3, %v987_v4 }
 0x823   :  { %v966_v43 = vpop.f32.mrf.mxu1 }
 0x824   :  { %v989_v25 = vand.u32 2147483647, %v966_v43  ;;  %v1002_v20 = vmax.f32.f32 %v998_v22, %v990_v1  ;;  %v1003_v19 = vmax.f32.f32 %v999_v24, %v1000_v26 }
 0x826   :  { %v1001_v18 = vmax.f32.f32 %v997_v23, %v989_v25 }
 0x828   :  { %v1004_v16 = vmax.f32.f32 %v1001_v18, %v1002_v20 }
 0x82a   :  { %v1005_v17 = vmax.f32.f32 %v1003_v19, %v1004_v16 }
 0x82c   :  { %1006 = vmax.xlane.f32.xlu1 %v1005_v17 }
 0x8b5   :  { %v1007_v28 = vpop.xlane.xlu1 %1006 }
 0x8b6   :  { %v1008_v38 = vrot.slane %v1007_v28, 4 }
 0x8b8   :  { %v1009_v41 = vmax.f32 %v1007_v28, %v1008_v38 }
 0x8ba   :  { %v1010_v51 = vrot.slane %v1009_v41, 2 }
 0x8bc   :  { %v1011_v42 = vmax.f32 %v1009_v41, %v1010_v51 }
 0x8be   :  { %v1012_v46 = vrot.slane %v1011_v42, 1 }
 0x8c0   :  { %v1013_v47 = vmax.f32 %v1011_v42, %v1012_v46 }
 0x8c2   :  { %3181 = vpush %v1013_v47 }
 0x8f3   :  { %s3182_s18 = spop %3181 }
 0x8f4   :  { %v1015_v54 = vstv %s3182_s18 }
 0x8f5   :  { %v1016_v55 = vmax.f32 %v1015_v54, 1e-30 }
 0x8f7   :  { %3215 = vrcp.f32 %v1016_v55 }
 0x904   :  { %v3216_v35 = vpop.eup %3215 }
 0x905   :  { %v3641_v56 = vmul.f32 %v3216_v35, %v2836_v12  ;;  %v1023_v36 = vmul.f32 %v3216_v35, %v896_v27  ;;  %v1037_v33 = vmul.f32 %v3216_v35, %v966_v43  ;;  %3217 = vlog2.f32 %v3216_v35 }
 0x906   :  { %v1036_v30 = vmul.f32 %v3216_v35, %v2833_v49  ;;  %v1035_v31 = vmul.f32 %v3216_v35, %v956_v7  ;;  %v1034_v15 = vmul.f32 %v3216_v35, %v3626_v37  ;;  %v1033_v27 = vmul.f32 %v3216_v35, %v3628_v60 }
 0x907   :  { %2837 = vmatprep.subr.mxu0 %v3641_v56  ;;  %2869 = vmatprep.mubr.f32.mxu0 %v1023_v36  ;;  %v1032_v61 = vmul.f32 %v3216_v35, %v3622_v58  ;;  %v1031_v52 = vmul.f32 %v3216_v35, %v3624_v59  ;;  %v1030_v48 = vmul.f32 %v3216_v35, %v3618_v29 }
 0x908   :  { %2838 = vmatpush3.msra.mxu0 %v3641_v56  ;;  %v1029_v37 = vmul.f32 %v3216_v35, %v3620_v57  ;;  %v1028_v58 = vmul.f32 %v3216_v35, %v3614_v62  ;;  %v1027_v59 = vmul.f32 %v3216_v35, %v3616_v63  ;;  %v1026_v29 = vmul.f32 %v3216_v35, %v3610_v21 }
 0x909   :  { %2839 = vmatprep.subr.mxu0 %v1037_v33  ;;  %v1025_v57 = vmul.f32 %v3216_v35, %v3612_v34  ;;  %v1024_v45 = vmul.f32 %v3216_v35, %v3608_v13 }
 0x90a   :  { %2840 = vmatpush3.msra.mxu0 %v1037_v33 }
 0x90b   :  { %2841 = vmatprep.subr.mxu0 %v1036_v30 }
 0x90c   :  { %2842 = vmatpush3.msra.mxu0 %v1036_v30 }
 0x90d   :  { %2843 = vmatprep.subr.mxu0 %v1035_v31 }
 0x90e   :  { %2844 = vmatpush3.msra.mxu0 %v1035_v31 }
 0x90f   :  { %2845 = vmatprep.subr.mxu0 %v1034_v15 }
 0x910   :  { %2846 = vmatpush3.msra.mxu0 %v1034_v15 }
 0x911   :  { %2847 = vmatprep.subr.mxu0 %v1033_v27 }
 0x912   :  { %2848 = vmatpush3.msra.mxu0 %v1033_v27  ;;  %v3218_v53 = vpop.eup %3217 }
 0x913   :  { %2849 = vmatprep.subr.mxu0 %v1032_v61  ;;  %v1020_v49 = vmul.f32 0.6931472, %v3218_v53 }
 0x914   :  { %2850 = vmatpush3.msra.mxu0 %v1032_v61 }
 0x915   :  { %2851 = vmatprep.subr.mxu0 %v1031_v52  ;;  %v3651_v44 = vmul.f32 0.0625, %v1020_v49 }
 0x916   :  { %2852 = vmatpush3.msra.mxu0 %v1031_v52 }
 0x917   :  { %2853 = vmatprep.subr.mxu0 %v1030_v48  ;;  %v1022_v60 = vsub.f32 %v3601_v32, %v3651_v44 }
 0x918   :  { %2854 = vmatpush3.msra.mxu0 %v1030_v48 }
 0x919   :  { %2855 = vmatprep.subr.mxu0 %v1029_v37 }
 0x91a   :  { %2856 = vmatpush3.msra.mxu0 %v1029_v37 }
 0x91b   :  { %2857 = vmatprep.subr.mxu0 %v1028_v58 }
 0x91c   :  { %2858 = vmatpush3.msra.mxu0 %v1028_v58 }
 0x91d   :  { %2859 = vmatprep.subr.mxu0 %v1027_v59 }
 0x91e   :  { %2860 = vmatpush3.msra.mxu0 %v1027_v59 }
 0x91f   :  { %2861 = vmatprep.subr.mxu0 %v1026_v29 }
 0x920   :  { %2862 = vmatpush3.msra.mxu0 %v1026_v29 }
 0x921   :  { %2863 = vmatprep.subr.mxu0 %v1025_v57 }
 0x922   :  { %2864 = vmatpush3.msra.mxu0 %v1025_v57 }
 0x923   :  { %2865 = vmatprep.subr.mxu0 %v1024_v45 }
 0x924   :  { %2866 = vmatpush3.msra.mxu0 %v1024_v45 }
 0x925   :  { %2867 = vmatprep.subr.mxu0 %v1023_v36 }
 0x926   :  { %2868 = vmatpush3.msra.mxu0 %v1023_v36 }
 0x927   :  { %2870 = vmatmul.mubr.f32.vlgmr.msra.gmra.mxu0 %v1024_v45 }
 0x928   :  { %2872 = vmatprep.mubr.f32.mxu0 %v1025_v57 }
 0x92b   :  { %2873 = vmatmul.mubr.f32.gmra.mxu0 %v1026_v29 }
 0x92c   :  { %2875 = vmatprep.mubr.f32.mxu0 %v1027_v59 }
 0x92f   :  { %2876 = vmatmul.mubr.f32.gmra.mxu0 %v1028_v58 }
 0x930   :  { %2878 = vmatprep.mubr.f32.mxu0 %v1029_v37 }
 0x933   :  { %2879 = vmatmul.mubr.f32.gmra.mxu0 %v1030_v48 }
 0x934   :  { %2881 = vmatprep.mubr.f32.mxu0 %v1031_v52 }
 0x937   :  { %2882 = vmatmul.mubr.f32.gmra.mxu0 %v1032_v61 }
 0x938   :  { %2884 = vmatprep.mubr.f32.mxu0 %v1033_v27 }
 0x93b   :  { %2885 = vmatmul.mubr.f32.gmra.mxu0 %v1034_v15 }
 0x93c   :  { %2887 = vmatprep.mubr.f32.mxu0 %v1035_v31 }
 0x93f   :  { %2888 = vmatmul.mubr.f32.gmra.mxu0 %v1036_v30 }
 0x940   :  { %2890 = vmatprep.mubr.f32.mxu0 %v1037_v33 }
 0x943   :  { %2891 = vmatmul.mubr.f32.gmra.mxu0 %v3641_v56 }
 0x9e7   :  { %v3661_v13 = vpop.f32.mrf.mxu0 }
 0x9e8   :  { %v1185_v4 = vand.u32 2147483647, %v3661_v13 }
 0x9e9   :  { %v1105_v21 = vpop.f32.mrf.mxu0 }
 0x9ea   :  { %v1184_v2 = vand.u32 2147483647, %v1105_v21 }
 0x9eb   :  { %v3663_v34 = vpop.f32.mrf.mxu0 }
 0x9ec   :  { %v1187_v1 = vand.u32 2147483647, %v3663_v34 }
 0x9ed   :  { %v3665_v62 = vpop.f32.mrf.mxu0 }
 0x9ee   :  { %v1186_v14 = vand.u32 2147483647, %v3665_v62 }
 0x9ef   :  { %v3667_v63 = vpop.f32.mrf.mxu0 }
 0x9f0   :  { %v1189_v5 = vand.u32 2147483647, %v3667_v63 }
 0x9f1   :  { %v3669_v50 = vpop.f32.mrf.mxu0 }
 0x9f2   :  { %v1188_v10 = vand.u32 2147483647, %v3669_v50  ;;  %v1201_v20 = vmax.f32.f32 %v1185_v4, %v1189_v5 }
 0x9f3   :  { %v3671_v39 = vpop.f32.mrf.mxu0 }
 0x9f4   :  { %v1191_v11 = vand.u32 2147483647, %v3671_v39  ;;  %v1200_v23 = vmax.f32.f32 %v1184_v2, %v1188_v10 }
 0x9f5   :  { %v3673_v40 = vpop.f32.mrf.mxu0 }
 0x9f6   :  { %v1190_v3 = vand.u32 2147483647, %v3673_v40  ;;  %v1203_v18 = vmax.f32.f32 %v1187_v1, %v1191_v11 }
 0x9f7   :  { %v3675_v6 = vpop.f32.mrf.mxu0 }
 0x9f8   :  { %v1193_v43 = vand.u32 2147483647, %v3675_v6  ;;  %v1202_v16 = vmax.f32.f32 %v1186_v14, %v1190_v3 }
 0x9f9   :  { %v3677_v7 = vpop.f32.mrf.mxu0 }
 0x9fa   :  { %v1192_v0 = vand.u32 2147483647, %v3677_v7  ;;  %v1205_v41 = vmax.f32.f32 %v1201_v20, %v1193_v43 }
 0x9fb   :  { %v3679_v8 = vpop.f32.mrf.mxu0 }
 0x9fc   :  { %v1195_v24 = vand.u32 2147483647, %v3679_v8  ;;  %v1204_v17 = vmax.f32.f32 %v1200_v23, %v1192_v0 }
 0x9fd   :  { %v3681_v9 = vpop.f32.mrf.mxu0 }
 0x9fe   :  { %v1194_v25 = vand.u32 2147483647, %v3681_v9  ;;  %v1207_v42 = vmax.f32.f32 %v1203_v18, %v1195_v24 }
 0x9ff   :  { %v2889_v12 = vpop.f32.mrf.mxu0 }
 0xa00   :  { %v1197_v28 = vand.u32 2147483647, %v2889_v12  ;;  %v1206_v46 = vmax.f32.f32 %v1202_v16, %v1194_v25 }
 0xa01   :  { %v1165_v22 = vpop.f32.mrf.mxu0 }
 0xa02   :  { %v1196_v26 = vand.u32 2147483647, %v1165_v22  ;;  %v1209_v55 = vmax.f32.f32 %v1205_v41, %v1197_v28 }
 0xa03   :  { %v2892_v19 = vpop.f32.mrf.mxu0 }
 0xa04   :  { %v1199_v38 = vand.u32 2147483647, %v2892_v19  ;;  %v1208_v47 = vmax.f32.f32 %v1204_v17, %v1196_v26 }
 0xa05   :  { %v1175_v51 = vpop.f32.mrf.mxu0 }
 0xa06   :  { %v1198_v54 = vand.u32 2147483647, %v1175_v51  ;;  %v1211_v35 = vmax.f32.f32 %v1207_v42, %v1199_v38  ;;  %v1212_v36 = vmax.f32.f32 %v1208_v47, %v1209_v55 }
 0xa08   :  { %v1210_v56 = vmax.f32.f32 %v1206_v46, %v1198_v54 }
 0xa0a   :  { %v1213_v33 = vmax.f32.f32 %v1210_v56, %v1211_v35 }
 0xa0c   :  { %v1214_v30 = vmax.f32.f32 %v1212_v36, %v1213_v33 }
 0xa0e   :  { %1215 = vmax.xlane.f32.xlu0 %v1214_v30 }
 0xa97   :  { %v1216_v31 = vpop.xlane.xlu0 %1215 }
 0xa98   :  { %v1217_v15 = vrot.slane %v1216_v31, 4 }
 0xa9a   :  { %v1218_v27 = vmax.f32 %v1216_v31, %v1217_v15 }
 0xa9c   :  { %v1219_v61 = vrot.slane %v1218_v27, 2 }
 0xa9e   :  { %v1220_v52 = vmax.f32 %v1218_v27, %v1219_v61 }
 0xaa0   :  { %v1221_v53 = vrot.slane %v1220_v52, 1 }
 0xaa2   :  { %v1222_v48 = vmax.f32 %v1220_v52, %v1221_v53 }
 0xaa4   :  { %3183 = vpush %v1222_v48 }
 0xad5   :  { %s3184_s19 = spop %3183 }
 0xad6   :  { %v1224_v49 = vstv %s3184_s19 }
 0xad7   :  { %v1225_v37 = vmax.f32 %v1224_v49, 1e-30 }
 0xad9   :  { %3219 = vrcp.f32 %v1225_v37 }
 0xae6   :  { %v3220_v58 = vpop.eup %3219 }
 0xae7   :  { %v3694_v59 = vmul.f32 %v3220_v58, %v2892_v19  ;;  %v1232_v29 = vmul.f32 %v3220_v58, %v1105_v21  ;;  %v1246_v57 = vmul.f32 %v3220_v58, %v1175_v51  ;;  %3221 = vlog2.f32 %v3220_v58 }
 0xae8   :  { %v1245_v45 = vmul.f32 %v3220_v58, %v2889_v12  ;;  %v1244_v10 = vmul.f32 %v3220_v58, %v1165_v22  ;;  %v1243_v4 = vmul.f32 %v3220_v58, %v3679_v8  ;;  %v1242_v21 = vmul.f32 %v3220_v58, %v3681_v9 }
 0xae9   :  { %2893 = vmatprep.subr.mxu1 %v3694_v59  ;;  %2925 = vmatprep.mubr.f32.mxu1 %v1232_v29  ;;  %v1241_v5 = vmul.f32 %v3220_v58, %v3675_v6  ;;  %v1240_v11 = vmul.f32 %v3220_v58, %v3677_v7  ;;  %v1239_v2 = vmul.f32 %v3220_v58, %v3671_v39 }
 0xaea   :  { %2894 = vmatpush3.msra.mxu1 %v3694_v59  ;;  %v1238_v8 = vmul.f32 %v3220_v58, %v3673_v40  ;;  %v1237_v9 = vmul.f32 %v3220_v58, %v3667_v63  ;;  %v1236_v7 = vmul.f32 %v3220_v58, %v3669_v50  ;;  %v1235_v39 = vmul.f32 %v3220_v58, %v3663_v34 }
 0xaeb   :  { %2895 = vmatprep.subr.mxu1 %v1246_v57  ;;  %v1234_v40 = vmul.f32 %v3220_v58, %v3665_v62  ;;  %v1233_v63 = vmul.f32 %v3220_v58, %v3661_v13 }
 0xaec   :  { %2896 = vmatpush3.msra.mxu1 %v1246_v57 }
 0xaed   :  { %2897 = vmatprep.subr.mxu1 %v1245_v45 }
 0xaee   :  { %2898 = vmatpush3.msra.mxu1 %v1245_v45 }
 0xaef   :  { %2899 = vmatprep.subr.mxu1 %v1244_v10 }
 0xaf0   :  { %2900 = vmatpush3.msra.mxu1 %v1244_v10 }
 0xaf1   :  { %2901 = vmatprep.subr.mxu1 %v1243_v4 }
 0xaf2   :  { %2902 = vmatpush3.msra.mxu1 %v1243_v4 }
 0xaf3   :  { %2903 = vmatprep.subr.mxu1 %v1242_v21 }
 0xaf4   :  { %2904 = vmatpush3.msra.mxu1 %v1242_v21  ;;  %v3222_v12 = vpop.eup %3221 }
 0xaf5   :  { %2905 = vmatprep.subr.mxu1 %v1241_v5  ;;  %v1229_v3 = vmul.f32 0.6931472, %v3222_v12 }
 0xaf6   :  { %2906 = vmatpush3.msra.mxu1 %v1241_v5 }
 0xaf7   :  { %2907 = vmatprep.subr.mxu1 %v1240_v11  ;;  %v1230_v0 = vmul.f32 0.03125, %v1229_v3 }
 0xaf8   :  { %2908 = vmatpush3.msra.mxu1 %v1240_v11 }
 0xaf9   :  { %2909 = vmatprep.subr.mxu1 %v1239_v2  ;;  %v3708_v6 = vsub.f32 %v1022_v60, %v1230_v0 }
 0xafa   :  { %2910 = vmatpush3.msra.mxu1 %v1239_v2 }
 0xafb   :  { %2911 = vmatprep.subr.mxu1 %v1238_v8 }
 0xafc   :  { %2912 = vmatpush3.msra.mxu1 %v1238_v8 }
 0xafd   :  { %2913 = vmatprep.subr.mxu1 %v1237_v9 }
 0xafe   :  { %2914 = vmatpush3.msra.mxu1 %v1237_v9 }
 0xaff   :  { %2915 = vmatprep.subr.mxu1 %v1236_v7 }
 0xb00   :  { %2916 = vmatpush3.msra.mxu1 %v1236_v7 }
 0xb01   :  { %2917 = vmatprep.subr.mxu1 %v1235_v39 }
 0xb02   :  { %2918 = vmatpush3.msra.mxu1 %v1235_v39 }
 0xb03   :  { %2919 = vmatprep.subr.mxu1 %v1234_v40 }
 0xb04   :  { %2920 = vmatpush3.msra.mxu1 %v1234_v40 }
 0xb05   :  { %2921 = vmatprep.subr.mxu1 %v1233_v63 }
 0xb06   :  { %2922 = vmatpush3.msra.mxu1 %v1233_v63 }
 0xb07   :  { %2923 = vmatprep.subr.mxu1 %v1232_v29 }
 0xb08   :  { %2924 = vmatpush3.msra.mxu1 %v1232_v29 }
 0xb09   :  { %2926 = vmatmul.mubr.f32.vlgmr.msra.gmra.mxu1 %v1233_v63 }
 0xb0a   :  { %2928 = vmatprep.mubr.f32.mxu1 %v1234_v40 }
 0xb0d   :  { %2929 = vmatmul.mubr.f32.gmra.mxu1 %v1235_v39 }
 0xb0e   :  { %2931 = vmatprep.mubr.f32.mxu1 %v1236_v7 }
 0xb11   :  { %2932 = vmatmul.mubr.f32.gmra.mxu1 %v1237_v9 }
 0xb12   :  { %2934 = vmatprep.mubr.f32.mxu1 %v1238_v8 }
 0xb15   :  { %2935 = vmatmul.mubr.f32.gmra.mxu1 %v1239_v2 }
 0xb16   :  { %2937 = vmatprep.mubr.f32.mxu1 %v1240_v11 }
 0xb19   :  { %2938 = vmatmul.mubr.f32.gmra.mxu1 %v1241_v5 }
 0xb1a   :  { %2940 = vmatprep.mubr.f32.mxu1 %v1242_v21 }
 0xb1d   :  { %2941 = vmatmul.mubr.f32.gmra.mxu1 %v1243_v4 }
 0xb1e   :  { %2943 = vmatprep.mubr.f32.mxu1 %v1244_v10 }
 0xb21   :  { %2944 = vmatmul.mubr.f32.gmra.mxu1 %v1245_v45 }
 0xb22   :  { %2946 = vmatprep.mubr.f32.mxu1 %v1246_v57 }
 0xb25   :  { %2947 = vmatmul.mubr.f32.gmra.mxu1 %v3694_v59 }
 0xbc9   :  { %v3715_v32 = vpop.f32.mrf.mxu1 }
 0xbca   :  { %v1394_v25 = vand.u32 2147483647, %v3715_v32 }
 0xbcb   :  { %v1314_v44 = vpop.f32.mrf.mxu1 }
 0xbcc   :  { %v1393_v19 = vand.u32 2147483647, %v1314_v44 }
 0xbcd   :  { %v3717_v60 = vpop.f32.mrf.mxu1 }
 0xbce   :  { %v1396_v28 = vand.u32 2147483647, %v3717_v60 }
 0xbcf   :  { %v3719_v13 = vpop.f32.mrf.mxu1 }
 0xbd0   :  { %v1395_v38 = vand.u32 2147483647, %v3719_v13 }
 0xbd1   :  { %v3721_v34 = vpop.f32.mrf.mxu1 }
 0xbd2   :  { %v1398_v26 = vand.u32 2147483647, %v3721_v34 }
 0xbd3   :  { %v3723_v62 = vpop.f32.mrf.mxu1 }
 0xbd4   :  { %v1397_v24 = vand.u32 2147483647, %v3723_v62  ;;  %v1410_v55 = vmax.f32.f32 %v1394_v25, %v1398_v26 }
 0xbd5   :  { %v3725_v50 = vpop.f32.mrf.mxu1 }
 0xbd6   :  { %v1400_v20 = vand.u32 2147483647, %v3725_v50  ;;  %v1409_v42 = vmax.f32.f32 %v1393_v19, %v1397_v24 }
 0xbd7   :  { %v3727_v1 = vpop.f32.mrf.mxu1 }
 0xbd8   :  { %v1399_v16 = vand.u32 2147483647, %v3727_v1  ;;  %v1412_v35 = vmax.f32.f32 %v1396_v28, %v1400_v20 }
 0xbd9   :  { %v3729_v14 = vpop.f32.mrf.mxu1 }
 0xbda   :  { %v1402_v41 = vand.u32 2147483647, %v3729_v14  ;;  %v1411_v36 = vmax.f32.f32 %v1395_v38, %v1399_v16 }
 0xbdb   :  { %v3731_v43 = vpop.f32.mrf.mxu1 }
 0xbdc   :  { %v1401_v17 = vand.u32 2147483647, %v3731_v43  ;;  %v1414_v15 = vmax.f32.f32 %v1410_v55, %v1402_v41 }
 0xbdd   :  { %v3733_v22 = vpop.f32.mrf.mxu1 }
 0xbde   :  { %v1404_v46 = vand.u32 2147483647, %v3733_v22  ;;  %v1413_v33 = vmax.f32.f32 %v1409_v42, %v1401_v17 }
 0xbdf   :  { %v3735_v23 = vpop.f32.mrf.mxu1 }
 0xbe0   :  { %v1403_v47 = vand.u32 2147483647, %v3735_v23  ;;  %v1416_v61 = vmax.f32.f32 %v1412_v35, %v1404_v46 }
 0xbe1   :  { %v2945_v18 = vpop.f32.mrf.mxu1 }
 0xbe2   :  { %v1406_v30 = vand.u32 2147483647, %v2945_v18  ;;  %v1415_v52 = vmax.f32.f32 %v1411_v36, %v1403_v47 }
 0xbe3   :  { %v1374_v51 = vpop.f32.mrf.mxu1 }
 0xbe4   :  { %v1405_v54 = vand.u32 2147483647, %v1374_v51  ;;  %v1418_v49 = vmax.f32.f32 %v1414_v15, %v1406_v30 }
 0xbe5   :  { %v2948_v56 = vpop.f32.mrf.mxu1 }
 0xbe6   :  { %v1408_v31 = vand.u32 2147483647, %v2948_v56  ;;  %v1417_v53 = vmax.f32.f32 %v1413_v33, %v1405_v54 }
 0xbe7   :  { %v1384_v27 = vpop.f32.mrf.mxu1 }
 0xbe8   :  { %v1407_v48 = vand.u32 2147483647, %v1384_v27  ;;  %v1420_v37 = vmax.f32.f32 %v1416_v61, %v1408_v31  ;;  %v1421_v59 = vmax.f32.f32 %v1417_v53, %v1418_v49 }
 0xbea   :  { %v1419_v58 = vmax.f32.f32 %v1415_v52, %v1407_v48 }
 0xbec   :  { %v1422_v29 = vmax.f32.f32 %v1419_v58, %v1420_v37 }
 0xbee   :  { %v1423_v57 = vmax.f32.f32 %v1421_v59, %v1422_v29 }
 0xbf0   :  { %1424 = vmax.xlane.f32.xlu1 %v1423_v57 }
 0xc79   :  { %v1425_v45 = vpop.xlane.xlu1 %1424 }
 0xc7a   :  { %v1426_v10 = vrot.slane %v1425_v45, 4 }
 0xc7c   :  { %v1427_v4 = vmax.f32 %v1425_v45, %v1426_v10 }
 0xc7e   :  { %v1428_v21 = vrot.slane %v1427_v4, 2 }
 0xc80   :  { %v1429_v5 = vmax.f32 %v1427_v4, %v1428_v21 }
 0xc82   :  { %v1430_v11 = vrot.slane %v1429_v5, 1 }
 0xc84   :  { %v1431_v12 = vmax.f32 %v1429_v5, %v1430_v11 }
 0xc86   :  { %3185 = vpush %v1431_v12 }
 0xcb7   :  { %s3186_s20 = spop %3185 }
 0xcb8   :  { %v1433_v2 = vstv %s3186_s20 }
 0xcb9   :  { %v1434_v3 = vmax.f32 %v1433_v2, 1e-30 }
 0xcbb   :  { %3223 = vrcp.f32 %v1434_v3 }
 0xcc8   :  { %v3224_v8 = vpop.eup %3223 }
 0xcc9   :  { %v3748_v0 = vmul.f32 %v3224_v8, %v2948_v56  ;;  %v1441_v9 = vmul.f32 %v3224_v8, %v1314_v44  ;;  %v1455_v7 = vmul.f32 %v3224_v8, %v1384_v27  ;;  %3225 = vlog2.f32 %v3224_v8 }
 0xcca   :  { %v1454_v39 = vmul.f32 %v3224_v8, %v2945_v18  ;;  %v1453_v40 = vmul.f32 %v3224_v8, %v1374_v51  ;;  %v1452_v63 = vmul.f32 %v3224_v8, %v3733_v22  ;;  %v1451_v44 = vmul.f32 %v3224_v8, %v3735_v23 }
 0xccb   :  { %2949 = vmatprep.subr.mxu0 %v3748_v0  ;;  %2981 = vmatprep.mubr.f32.mxu0 %v1441_v9  ;;  %v1450_v24 = vmul.f32 %v3224_v8, %v3729_v14  ;;  %v1449_v25 = vmul.f32 %v3224_v8, %v3731_v43  ;;  %v1448_v20 = vmul.f32 %v3224_v8, %v3725_v50 }
 0xccc   :  { %2950 = vmatpush3.msra.mxu0 %v3748_v0  ;;  %v1447_v22 = vmul.f32 %v3224_v8, %v3727_v1  ;;  %v1446_v14 = vmul.f32 %v3224_v8, %v3721_v34  ;;  %v1445_v43 = vmul.f32 %v3224_v8, %v3723_v62  ;;  %v1444_v50 = vmul.f32 %v3224_v8, %v3717_v60 }
 0xccd   :  { %2951 = vmatprep.subr.mxu0 %v1455_v7  ;;  %v1443_v1 = vmul.f32 %v3224_v8, %v3719_v13  ;;  %v1442_v16 = vmul.f32 %v3224_v8, %v3715_v32 }
 0xcce   :  { %2952 = vmatpush3.msra.mxu0 %v1455_v7 }
 0xccf   :  { %2953 = vmatprep.subr.mxu0 %v1454_v39 }
 0xcd0   :  { %2954 = vmatpush3.msra.mxu0 %v1454_v39 }
 0xcd1   :  { %2955 = vmatprep.subr.mxu0 %v1453_v40 }
 0xcd2   :  { %2956 = vmatpush3.msra.mxu0 %v1453_v40 }
 0xcd3   :  { %2957 = vmatprep.subr.mxu0 %v1452_v63 }
 0xcd4   :  { %2958 = vmatpush3.msra.mxu0 %v1452_v63 }
 0xcd5   :  { %2959 = vmatprep.subr.mxu0 %v1451_v44 }
 0xcd6   :  { %2960 = vmatpush3.msra.mxu0 %v1451_v44  ;;  %v3226_v26 = vpop.eup %3225 }
 0xcd7   :  { %2961 = vmatprep.subr.mxu0 %v1450_v24  ;;  %v1438_v18 = vmul.f32 0.6931472, %v3226_v26 }
 0xcd8   :  { %2962 = vmatpush3.msra.mxu0 %v1450_v24 }
 0xcd9   :  { %2963 = vmatprep.subr.mxu0 %v1449_v25  ;;  %v3758_v19 = vmul.f32 0.015625, %v1438_v18 }
 0xcda   :  { %2964 = vmatpush3.msra.mxu0 %v1449_v25 }
 0xcdb   :  { %2965 = vmatprep.subr.mxu0 %v1448_v20  ;;  %v1440_v23 = vsub.f32 %v3708_v6, %v3758_v19 }
 0xcdc   :  { %2966 = vmatpush3.msra.mxu0 %v1448_v20 }
 0xcdd   :  { %2967 = vmatprep.subr.mxu0 %v1447_v22 }
 0xcde   :  { %2968 = vmatpush3.msra.mxu0 %v1447_v22 }
 0xcdf   :  { %2969 = vmatprep.subr.mxu0 %v1446_v14 }
 0xce0   :  { %2970 = vmatpush3.msra.mxu0 %v1446_v14 }
 0xce1   :  { %2971 = vmatprep.subr.mxu0 %v1445_v43 }
 0xce2   :  { %2972 = vmatpush3.msra.mxu0 %v1445_v43 }
 0xce3   :  { %2973 = vmatprep.subr.mxu0 %v1444_v50 }
 0xce4   :  { %2974 = vmatpush3.msra.mxu0 %v1444_v50 }
 0xce5   :  { %2975 = vmatprep.subr.mxu0 %v1443_v1 }
 0xce6   :  { %2976 = vmatpush3.msra.mxu0 %v1443_v1 }
 0xce7   :  { %2977 = vmatprep.subr.mxu0 %v1442_v16 }
 0xce8   :  { %2978 = vmatpush3.msra.mxu0 %v1442_v16 }
 0xce9   :  { %2979 = vmatprep.subr.mxu0 %v1441_v9 }
 0xcea   :  { %2980 = vmatpush3.msra.mxu0 %v1441_v9 }
 0xceb   :  { %2982 = vmatmul.mubr.f32.vlgmr.msra.gmra.mxu0 %v1442_v16 }
 0xcec   :  { %2984 = vmatprep.mubr.f32.mxu0 %v1443_v1 }
 0xcef   :  { %2985 = vmatmul.mubr.f32.gmra.mxu0 %v1444_v50 }
 0xcf0   :  { %2987 = vmatprep.mubr.f32.mxu0 %v1445_v43 }
 0xcf3   :  { %2988 = vmatmul.mubr.f32.gmra.mxu0 %v1446_v14 }
 0xcf4   :  { %2990 = vmatprep.mubr.f32.mxu0 %v1447_v22 }
 0xcf7   :  { %2991 = vmatmul.mubr.f32.gmra.mxu0 %v1448_v20 }
 0xcf8   :  { %2993 = vmatprep.mubr.f32.mxu0 %v1449_v25 }
 0xcfb   :  { %2994 = vmatmul.mubr.f32.gmra.mxu0 %v1450_v24 }
 0xcfc   :  { %2996 = vmatprep.mubr.f32.mxu0 %v1451_v44 }
 0xcff   :  { %2997 = vmatmul.mubr.f32.gmra.mxu0 %v1452_v63 }
 0xd00   :  { %2999 = vmatprep.mubr.f32.mxu0 %v1453_v40 }
 0xd03   :  { %3000 = vmatmul.mubr.f32.gmra.mxu0 %v1454_v39 }
 0xd04   :  { %3002 = vmatprep.mubr.f32.mxu0 %v1455_v7 }
 0xd07   :  { %3003 = vmatmul.mubr.f32.gmra.mxu0 %v3748_v0 }
 0xdab   :  { %v3768_v32 = vpop.f32.mrf.mxu0 }
 0xdac   :  { %v1603_v54 = vand.u32 2147483647, %v3768_v32 }
 0xdad   :  { %v1523_v60 = vpop.f32.mrf.mxu0 }
 0xdae   :  { %v1602_v36 = vand.u32 2147483647, %v1523_v60 }
 0xdaf   :  { %v3770_v13 = vpop.f32.mrf.mxu0 }
 0xdb0   :  { %v1605_v31 = vand.u32 2147483647, %v3770_v13 }
 0xdb1   :  { %v3772_v34 = vpop.f32.mrf.mxu0 }
 0xdb2   :  { %v1604_v15 = vand.u32 2147483647, %v3772_v34 }
 0xdb3   :  { %v3774_v62 = vpop.f32.mrf.mxu0 }
 0xdb4   :  { %v1607_v55 = vand.u32 2147483647, %v3774_v62 }
 0xdb5   :  { %v3776_v17 = vpop.f32.mrf.mxu0 }
 0xdb6   :  { %v1606_v47 = vand.u32 2147483647, %v3776_v17  ;;  %v1619_v37 = vmax.f32.f32 %v1603_v54, %v1607_v55 }
 0xdb7   :  { %v3778_v28 = vpop.f32.mrf.mxu0 }
 0xdb8   :  { %v1609_v35 = vand.u32 2147483647, %v3778_v28  ;;  %v1618_v52 = vmax.f32.f32 %v1602_v36, %v1606_v47 }
 0xdb9   :  { %v3780_v38 = vpop.f32.mrf.mxu0 }
 0xdba   :  { %v1608_v33 = vand.u32 2147483647, %v3780_v38  ;;  %v1621_v58 = vmax.f32.f32 %v1605_v31, %v1609_v35 }
 0xdbb   :  { %v3782_v41 = vpop.f32.mrf.mxu0 }
 0xdbc   :  { %v1611_v27 = vand.u32 2147483647, %v3782_v41  ;;  %v1620_v29 = vmax.f32.f32 %v1604_v15, %v1608_v33 }
 0xdbd   :  { %v3784_v51 = vpop.f32.mrf.mxu0 }
 0xdbe   :  { %v1610_v30 = vand.u32 2147483647, %v3784_v51  ;;  %v1623_v4 = vmax.f32.f32 %v1619_v37, %v1611_v27 }
 0xdbf   :  { %v3786_v42 = vpop.f32.mrf.mxu0 }
 0xdc0   :  { %v1613_v53 = vand.u32 2147483647, %v3786_v42  ;;  %v1622_v57 = vmax.f32.f32 %v1618_v52, %v1610_v30 }
 0xdc1   :  { %v3788_v46 = vpop.f32.mrf.mxu0 }
 0xdc2   :  { %v1612_v48 = vand.u32 2147483647, %v3788_v46  ;;  %v1625_v5 = vmax.f32.f32 %v1621_v58, %v1613_v53 }
 0xdc3   :  { %v3001_v56 = vpop.f32.mrf.mxu0 }
 0xdc4   :  { %v1615_v45 = vand.u32 2147483647, %v3001_v56  ;;  %v1624_v11 = vmax.f32.f32 %v1620_v29, %v1612_v48 }
 0xdc5   :  { %v1583_v61 = vpop.f32.mrf.mxu0 }
 0xdc6   :  { %v1614_v49 = vand.u32 2147483647, %v1583_v61  ;;  %v1627_v3 = vmax.f32.f32 %v1623_v4, %v1615_v45 }
 0xdc7   :  { %v3004_v59 = vpop.f32.mrf.mxu0 }
 0xdc8   :  { %v1617_v10 = vand.u32 2147483647, %v3004_v59  ;;  %v1626_v12 = vmax.f32.f32 %v1622_v57, %v1614_v49 }
 0xdc9   :  { %v1593_v21 = vpop.f32.mrf.mxu0 }
 0xdca   :  { %v1616_v2 = vand.u32 2147483647, %v1593_v21  ;;  %v1629_v8 = vmax.f32.f32 %v1625_v5, %v1617_v10  ;;  %v1630_v9 = vmax.f32.f32 %v1626_v12, %v1627_v3 }
 0xdcc   :  { %v1628_v0 = vmax.f32.f32 %v1624_v11, %v1616_v2 }
 0xdce   :  { %v1631_v7 = vmax.f32.f32 %v1628_v0, %v1629_v8 }
 0xdd0   :  { %v1632_v39 = vmax.f32.f32 %v1630_v9, %v1631_v7 }
 0xdd2   :  { %1633 = vmax.xlane.f32.xlu0 %v1632_v39 }
 0xe5b   :  { %v1634_v40 = vpop.xlane.xlu0 %1633 }
 0xe5c   :  { %v1635_v63 = vrot.slane %v1634_v40, 4 }
 0xe5e   :  { %v1636_v44 = vmax.f32 %v1634_v40, %v1635_v63 }
 0xe60   :  { %v1637_v24 = vrot.slane %v1636_v44, 2 }
 0xe62   :  { %v1638_v25 = vmax.f32 %v1636_v44, %v1637_v24 }
 0xe64   :  { %v1639_v26 = vrot.slane %v1638_v25, 1 }
 0xe66   :  { %v1640_v20 = vmax.f32 %v1638_v25, %v1639_v26 }
 0xe68   :  { %3187 = vpush %v1640_v20 }
 0xe99   :  { %s3188_s21 = spop %3187 }
 0xe9a   :  { %v1642_v18 = vstv %s3188_s21 }
 0xe9b   :  { %v1643_v22 = vmax.f32 %v1642_v18, 1e-30 }
 0xe9d   :  { %3227 = vrcp.f32 %v1643_v22 }
 0xeaa   :  { %v3228_v14 = vpop.eup %3227 }
 0xeab   :  { %v3801_v43 = vmul.f32 %v3228_v14, %v3004_v59  ;;  %v1650_v50 = vmul.f32 %v3228_v14, %v1523_v60  ;;  %v1664_v1 = vmul.f32 %v3228_v14, %v1593_v21  ;;  %3229 = vlog2.f32 %v3228_v14 }
 0xeac   :  { %v1663_v16 = vmul.f32 %v3228_v14, %v3001_v56  ;;  %v1662_v47 = vmul.f32 %v3228_v14, %v1583_v61  ;;  %v1661_v54 = vmul.f32 %v3228_v14, %v3786_v42  ;;  %v1660_v60 = vmul.f32 %v3228_v14, %v3788_v46 }
 0xead   :  { %3005 = vmatprep.subr.mxu1 %v3801_v43  ;;  %3037 = vmatprep.mubr.f32.mxu1 %v1650_v50  ;;  %v1659_v55 = vmul.f32 %v3228_v14, %v3782_v41  ;;  %v1658_v35 = vmul.f32 %v3228_v14, %v3784_v51  ;;  %v1657_v36 = vmul.f32 %v3228_v14, %v3778_v28 }
 0xeae   :  { %3006 = vmatpush3.msra.mxu1 %v3801_v43  ;;  %v1656_v42 = vmul.f32 %v3228_v14, %v3780_v38  ;;  %v1655_v46 = vmul.f32 %v3228_v14, %v3774_v62  ;;  %v1654_v51 = vmul.f32 %v3228_v14, %v3776_v17  ;;  %v1653_v28 = vmul.f32 %v3228_v14, %v3770_v13 }
 0xeaf   :  { %3007 = vmatprep.subr.mxu1 %v1664_v1  ;;  %v1652_v38 = vmul.f32 %v3228_v14, %v3772_v34  ;;  %v1651_v62 = vmul.f32 %v3228_v14, %v3768_v32 }
 0xeb0   :  { %3008 = vmatpush3.msra.mxu1 %v1664_v1 }
 0xeb1   :  { %3009 = vmatprep.subr.mxu1 %v1663_v16 }
 0xeb2   :  { %3010 = vmatpush3.msra.mxu1 %v1663_v16 }
 0xeb3   :  { %3011 = vmatprep.subr.mxu1 %v1662_v47 }
 0xeb4   :  { %3012 = vmatpush3.msra.mxu1 %v1662_v47 }
 0xeb5   :  { %3013 = vmatprep.subr.mxu1 %v1661_v54 }
 0xeb6   :  { %3014 = vmatpush3.msra.mxu1 %v1661_v54 }
 0xeb7   :  { %3015 = vmatprep.subr.mxu1 %v1660_v60 }
 0xeb8   :  { %3016 = vmatpush3.msra.mxu1 %v1660_v60  ;;  %v3230_v56 = vpop.eup %3229 }
 0xeb9   :  { %3017 = vmatprep.subr.mxu1 %v1659_v55  ;;  %v1647_v33 = vmul.f32 0.6931472, %v3230_v56 }
 0xeba   :  { %3018 = vmatpush3.msra.mxu1 %v1659_v55 }
 0xebb   :  { %3019 = vmatprep.subr.mxu1 %v1658_v35  ;;  %v1648_v30 = vmul.f32 0.0078125, %v1647_v33 }
 0xebc   :  { %3020 = vmatpush3.msra.mxu1 %v1658_v35 }
 0xebd   :  { %3021 = vmatprep.subr.mxu1 %v1657_v36  ;;  %v3815_v41 = vsub.f32 %v1440_v23, %v1648_v30 }
 0xebe   :  { %3022 = vmatpush3.msra.mxu1 %v1657_v36 }
 0xebf   :  { %3023 = vmatprep.subr.mxu1 %v1656_v42 }
 0xec0   :  { %3024 = vmatpush3.msra.mxu1 %v1656_v42 }
 0xec1   :  { %3025 = vmatprep.subr.mxu1 %v1655_v46 }
 0xec2   :  { %3026 = vmatpush3.msra.mxu1 %v1655_v46 }
 0xec3   :  { %3027 = vmatprep.subr.mxu1 %v1654_v51 }
 0xec4   :  { %3028 = vmatpush3.msra.mxu1 %v1654_v51 }
 0xec5   :  { %3029 = vmatprep.subr.mxu1 %v1653_v28 }
 0xec6   :  { %3030 = vmatpush3.msra.mxu1 %v1653_v28 }
 0xec7   :  { %3031 = vmatprep.subr.mxu1 %v1652_v38 }
 0xec8   :  { %3032 = vmatpush3.msra.mxu1 %v1652_v38 }
 0xec9   :  { %3033 = vmatprep.subr.mxu1 %v1651_v62 }
 0xeca   :  { %3034 = vmatpush3.msra.mxu1 %v1651_v62 }
 0xecb   :  { %3035 = vmatprep.subr.mxu1 %v1650_v50 }
 0xecc   :  { %3036 = vmatpush3.msra.mxu1 %v1650_v50 }
 0xecd   :  { %3038 = vmatmul.mubr.f32.vlgmr.msra.gmra.mxu1 %v1651_v62 }
 0xece   :  { %3040 = vmatprep.mubr.f32.mxu1 %v1652_v38 }
 0xed1   :  { %3041 = vmatmul.mubr.f32.gmra.mxu1 %v1653_v28 }
 0xed2   :  { %3043 = vmatprep.mubr.f32.mxu1 %v1654_v51 }
 0xed5   :  { %3044 = vmatmul.mubr.f32.gmra.mxu1 %v1655_v46 }
 0xed6   :  { %3046 = vmatprep.mubr.f32.mxu1 %v1656_v42 }
 0xed9   :  { %3047 = vmatmul.mubr.f32.gmra.mxu1 %v1657_v36 }
 0xeda   :  { %3049 = vmatprep.mubr.f32.mxu1 %v1658_v35 }
 0xedd   :  { %3050 = vmatmul.mubr.f32.gmra.mxu1 %v1659_v55 }
 0xede   :  { %3052 = vmatprep.mubr.f32.mxu1 %v1660_v60 }
 0xee1   :  { %3053 = vmatmul.mubr.f32.gmra.mxu1 %v1661_v54 }
 0xee2   :  { %3055 = vmatprep.mubr.f32.mxu1 %v1662_v47 }
 0xee5   :  { %3056 = vmatmul.mubr.f32.gmra.mxu1 %v1663_v16 }
 0xee6   :  { %3058 = vmatprep.mubr.f32.mxu1 %v1664_v1 }
 0xee9   :  { %3059 = vmatmul.mubr.f32.gmra.mxu1 %v3801_v43 }
 0xf8d   :  { %v3822_v6 = vpop.f32.mrf.mxu1 }
 0xf8e   :  { %v1812_v48 = vand.u32 2147483647, %v3822_v6 }
 0xf8f   :  { %v1732_v19 = vpop.f32.mrf.mxu1 }
 0xf90   :  { %v1811_v59 = vand.u32 2147483647, %v1732_v19 }
 0xf91   :  { %v3824_v23 = vpop.f32.mrf.mxu1 }
 0xf92   :  { %v1814_v45 = vand.u32 2147483647, %v3824_v23 }
 0xf93   :  { %v3826_v32 = vpop.f32.mrf.mxu1 }
 0xf94   :  { %v1813_v10 = vand.u32 2147483647, %v3826_v32 }
 0xf95   :  { %v3828_v13 = vpop.f32.mrf.mxu1 }
 0xf96   :  { %v1816_v49 = vand.u32 2147483647, %v3828_v13 }
 0xf97   :  { %v3830_v34 = vpop.f32.mrf.mxu1 }
 0xf98   :  { %v1815_v53 = vand.u32 2147483647, %v3830_v34  ;;  %v1828_v3 = vmax.f32.f32 %v1812_v48, %v1816_v49 }
 0xf99   :  { %v3832_v17 = vpop.f32.mrf.mxu1 }
 0xf9a   :  { %v1818_v37 = vand.u32 2147483647, %v3832_v17  ;;  %v1827_v5 = vmax.f32.f32 %v1811_v59, %v1815_v53 }
 0xf9b   :  { %v3834_v31 = vpop.f32.mrf.mxu1 }
 0xf9c   :  { %v1817_v29 = vand.u32 2147483647, %v3834_v31  ;;  %v1830_v8 = vmax.f32.f32 %v1814_v45, %v1818_v37 }
 0xf9d   :  { %v3836_v15 = vpop.f32.mrf.mxu1 }
 0xf9e   :  { %v1820_v4 = vand.u32 2147483647, %v3836_v15  ;;  %v1829_v9 = vmax.f32.f32 %v1813_v10, %v1817_v29 }
 0xf9f   :  { %v3838_v27 = vpop.f32.mrf.mxu1 }
 0xfa0   :  { %v1819_v57 = vand.u32 2147483647, %v3838_v27  ;;  %v1832_v63 = vmax.f32.f32 %v1828_v3, %v1820_v4 }
 0xfa1   :  { %v3840_v61 = vpop.f32.mrf.mxu1 }
 0xfa2   :  { %v1822_v11 = vand.u32 2147483647, %v3840_v61  ;;  %v1831_v7 = vmax.f32.f32 %v1827_v5, %v1819_v57 }
 0xfa3   :  { %v3842_v52 = vpop.f32.mrf.mxu1 }
 0xfa4   :  { %v1821_v12 = vand.u32 2147483647, %v3842_v52  ;;  %v1834_v24 = vmax.f32.f32 %v1830_v8, %v1822_v11 }
 0xfa5   :  { %v3057_v58 = vpop.f32.mrf.mxu1 }
 0xfa6   :  { %v1824_v39 = vand.u32 2147483647, %v3057_v58  ;;  %v1833_v25 = vmax.f32.f32 %v1829_v9, %v1821_v12 }
 0xfa7   :  { %v1792_v21 = vpop.f32.mrf.mxu1 }
 0xfa8   :  { %v1823_v2 = vand.u32 2147483647, %v1792_v21  ;;  %v1836_v18 = vmax.f32.f32 %v1832_v63, %v1824_v39 }
 0xfa9   :  { %v3060_v0 = vpop.f32.mrf.mxu1 }
 0xfaa   :  { %v1826_v40 = vand.u32 2147483647, %v3060_v0  ;;  %v1835_v26 = vmax.f32.f32 %v1831_v7, %v1823_v2 }
 0xfab   :  { %v1802_v44 = vpop.f32.mrf.mxu1 }
 0xfac   :  { %v1825_v20 = vand.u32 2147483647, %v1802_v44  ;;  %v1838_v22 = vmax.f32.f32 %v1834_v24, %v1826_v40  ;;  %v1839_v43 = vmax.f32.f32 %v1835_v26, %v1836_v18 }
 0xfae   :  { %v1837_v14 = vmax.f32.f32 %v1833_v25, %v1825_v20 }
 0xfb0   :  { %v1840_v50 = vmax.f32.f32 %v1837_v14, %v1838_v22 }
 0xfb2   :  { %v1841_v1 = vmax.f32.f32 %v1839_v43, %v1840_v50 }
 0xfb4   :  { %1842 = vmax.xlane.f32.xlu1 %v1841_v1 }
0x103d   :  { %v1843_v16 = vpop.xlane.xlu1 %1842 }
0x103e   :  { %v1844_v47 = vrot.slane %v1843_v16, 4 }
0x1040   :  { %v1845_v54 = vmax.f32 %v1843_v16, %v1844_v47 }
0x1042   :  { %v1846_v60 = vrot.slane %v1845_v54, 2 }
0x1044   :  { %v1847_v55 = vmax.f32 %v1845_v54, %v1846_v60 }
0x1046   :  { %v1848_v35 = vrot.slane %v1847_v55, 1 }
0x1048   :  { %v1849_v56 = vmax.f32 %v1847_v55, %v1848_v35 }
0x104a   :  { %3189 = vpush %v1849_v56 }
0x107b   :  { %s3190_s22 = spop %3189 }
0x107c   :  { %v1851_v36 = vstv %s3190_s22 }
0x107d   :  { %v1852_v33 = vmax.f32 %v1851_v36, 1e-30 }
0x107f   :  { %3231 = vrcp.f32 %v1852_v33 }
0x108c   :  { %v3232_v42 = vpop.eup %3231 }
0x108d   :  { %v3855_v30 = vmul.f32 %v3232_v42, %v3060_v0  ;;  %v1859_v46 = vmul.f32 %v3232_v42, %v1732_v19  ;;  %v1873_v51 = vmul.f32 %v3232_v42, %v1802_v44  ;;  %3233 = vlog2.f32 %v3232_v42 }
0x108e   :  { %v1872_v28 = vmul.f32 %v3232_v42, %v3057_v58  ;;  %v1871_v38 = vmul.f32 %v3232_v42, %v1792_v21  ;;  %v1870_v62 = vmul.f32 %v3232_v42, %v3840_v61  ;;  %v1869_v19 = vmul.f32 %v3232_v42, %v3842_v52 }
0x108f   :  { %3061 = vmatprep.subr.mxu0 %v3855_v30  ;;  %3093 = vmatprep.mubr.f32.mxu0 %v1859_v46  ;;  %v1868_v53 = vmul.f32 %v3232_v42, %v3836_v15  ;;  %v1867_v48 = vmul.f32 %v3232_v42, %v3838_v27  ;;  %v1866_v37 = vmul.f32 %v3232_v42, %v3832_v17 }
0x1090   :  { %3062 = vmatpush3.msra.mxu0 %v3855_v30  ;;  %v1865_v61 = vmul.f32 %v3232_v42, %v3834_v31  ;;  %v1864_v15 = vmul.f32 %v3232_v42, %v3828_v13  ;;  %v1863_v27 = vmul.f32 %v3232_v42, %v3830_v34  ;;  %v1862_v17 = vmul.f32 %v3232_v42, %v3824_v23 }
0x1091   :  { %3063 = vmatprep.subr.mxu0 %v1873_v51  ;;  %v1861_v31 = vmul.f32 %v3232_v42, %v3826_v32  ;;  %v1860_v29 = vmul.f32 %v3232_v42, %v3822_v6 }
0x1092   :  { %3064 = vmatpush3.msra.mxu0 %v1873_v51 }
0x1093   :  { %3065 = vmatprep.subr.mxu0 %v1872_v28 }
0x1094   :  { %3066 = vmatpush3.msra.mxu0 %v1872_v28 }
0x1095   :  { %3067 = vmatprep.subr.mxu0 %v1871_v38 }
0x1096   :  { %3068 = vmatpush3.msra.mxu0 %v1871_v38 }
0x1097   :  { %3069 = vmatprep.subr.mxu0 %v1870_v62 }
0x1098   :  { %3070 = vmatpush3.msra.mxu0 %v1870_v62 }
0x1099   :  { %3071 = vmatprep.subr.mxu0 %v1869_v19 }
0x109a   :  { %3072 = vmatpush3.msra.mxu0 %v1869_v19  ;;  %v3234_v49 = vpop.eup %3233 }
0x109b   :  { %3073 = vmatprep.subr.mxu0 %v1868_v53  ;;  %v1856_v58 = vmul.f32 0.6931472, %v3234_v49 }
0x109c   :  { %3074 = vmatpush3.msra.mxu0 %v1868_v53 }
0x109d   :  { %3075 = vmatprep.subr.mxu0 %v1867_v48  ;;  %v3865_v59 = vmul.f32 0.00390625, %v1856_v58 }
0x109e   :  { %3076 = vmatpush3.msra.mxu0 %v1867_v48 }
0x109f   :  { %3077 = vmatprep.subr.mxu0 %v1866_v37  ;;  %v1858_v52 = vsub.f32 %v3815_v41, %v3865_v59 }
0x10a0   :  { %3078 = vmatpush3.msra.mxu0 %v1866_v37 }
0x10a1   :  { %3079 = vmatprep.subr.mxu0 %v1865_v61 }
0x10a2   :  { %3080 = vmatpush3.msra.mxu0 %v1865_v61 }
0x10a3   :  { %3081 = vmatprep.subr.mxu0 %v1864_v15 }
0x10a4   :  { %3082 = vmatpush3.msra.mxu0 %v1864_v15 }
0x10a5   :  { %3083 = vmatprep.subr.mxu0 %v1863_v27 }
0x10a6   :  { %3084 = vmatpush3.msra.mxu0 %v1863_v27 }
0x10a7   :  { %3085 = vmatprep.subr.mxu0 %v1862_v17 }
0x10a8   :  { %3086 = vmatpush3.msra.mxu0 %v1862_v17 }
0x10a9   :  { %3087 = vmatprep.subr.mxu0 %v1861_v31 }
0x10aa   :  { %3088 = vmatpush3.msra.mxu0 %v1861_v31 }
0x10ab   :  { %3089 = vmatprep.subr.mxu0 %v1860_v29 }
0x10ac   :  { %3090 = vmatpush3.msra.mxu0 %v1860_v29 }
0x10ad   :  { %3091 = vmatprep.subr.mxu0 %v1859_v46 }
0x10ae   :  { %3092 = vmatpush3.msra.mxu0 %v1859_v46 }
0x10af   :  { %3094 = vmatmul.mubr.f32.vlgmr.msra.gmra.mxu0 %v1860_v29 }
0x10b0   :  { %3096 = vmatprep.mubr.f32.mxu0 %v1861_v31 }
0x10b3   :  { %3097 = vmatmul.mubr.f32.gmra.mxu0 %v1862_v17 }
0x10b4   :  { %3099 = vmatprep.mubr.f32.mxu0 %v1863_v27 }
0x10b7   :  { %3100 = vmatmul.mubr.f32.gmra.mxu0 %v1864_v15 }
0x10b8   :  { %3102 = vmatprep.mubr.f32.mxu0 %v1865_v61 }
0x10bb   :  { %3103 = vmatmul.mubr.f32.gmra.mxu0 %v1866_v37 }
0x10bc   :  { %3105 = vmatprep.mubr.f32.mxu0 %v1867_v48 }
0x10bf   :  { %3106 = vmatmul.mubr.f32.gmra.mxu0 %v1868_v53 }
0x10c0   :  { %3108 = vmatprep.mubr.f32.mxu0 %v1869_v19 }
0x10c3   :  { %3109 = vmatmul.mubr.f32.gmra.mxu0 %v1870_v62 }
0x10c4   :  { %3111 = vmatprep.mubr.f32.mxu0 %v1871_v38 }
0x10c7   :  { %3112 = vmatmul.mubr.f32.gmra.mxu0 %v1872_v28 }
0x10c8   :  { %3114 = vmatprep.mubr.f32.mxu0 %v1873_v51 }
0x10cb   :  { %3115 = vmatmul.mubr.f32.gmra.mxu0 %v3855_v30 }
0x116f   :  { %v3875_v6 = vpop.f32.mrf.mxu0 }
0x1170   :  { %v2021_v2 = vand.u32 2147483647, %v3875_v6 }
0x1171   :  { %v1941_v23 = vpop.f32.mrf.mxu0 }
0x1172   :  { %v2020_v9 = vand.u32 2147483647, %v1941_v23 }
0x1173   :  { %v3877_v32 = vpop.f32.mrf.mxu0 }
0x1174   :  { %v2023_v40 = vand.u32 2147483647, %v3877_v32 }
0x1175   :  { %v3879_v13 = vpop.f32.mrf.mxu0 }
0x1176   :  { %v2022_v63 = vand.u32 2147483647, %v3879_v13 }
0x1177   :  { %v3881_v34 = vpop.f32.mrf.mxu0 }
0x1178   :  { %v2025_v3 = vand.u32 2147483647, %v3881_v34 }
0x1179   :  { %v3883_v57 = vpop.f32.mrf.mxu0 }
0x117a   :  { %v2024_v12 = vand.u32 2147483647, %v3883_v57  ;;  %v2037_v22 = vmax.f32.f32 %v2021_v2, %v2025_v3 }
0x117b   :  { %v3885_v45 = vpop.f32.mrf.mxu0 }
0x117c   :  { %v2027_v8 = vand.u32 2147483647, %v3885_v45  ;;  %v2036_v25 = vmax.f32.f32 %v2020_v9, %v2024_v12 }
0x117d   :  { %v3887_v10 = vpop.f32.mrf.mxu0 }
0x117e   :  { %v2026_v7 = vand.u32 2147483647, %v3887_v10  ;;  %v2039_v14 = vmax.f32.f32 %v2023_v40, %v2027_v8 }
0x117f   :  { %v3889_v4 = vpop.f32.mrf.mxu0 }
0x1180   :  { %v2029_v44 = vand.u32 2147483647, %v3889_v4  ;;  %v2038_v50 = vmax.f32.f32 %v2022_v63, %v2026_v7 }
0x1181   :  { %v3891_v21 = vpop.f32.mrf.mxu0 }
0x1182   :  { %v2028_v39 = vand.u32 2147483647, %v3891_v21  ;;  %v2041_v54 = vmax.f32.f32 %v2037_v22, %v2029_v44 }
0x1183   :  { %v3893_v5 = vpop.f32.mrf.mxu0 }
0x1184   :  { %v2031_v26 = vand.u32 2147483647, %v3893_v5  ;;  %v2040_v1 = vmax.f32.f32 %v2036_v25, %v2028_v39 }
0x1185   :  { %v3895_v11 = vpop.f32.mrf.mxu0 }
0x1186   :  { %v2030_v20 = vand.u32 2147483647, %v3895_v11  ;;  %v2043_v55 = vmax.f32.f32 %v2039_v14, %v2031_v26 }
0x1187   :  { %v3113_v0 = vpop.f32.mrf.mxu0 }
0x1188   :  { %v2033_v16 = vand.u32 2147483647, %v3113_v0  ;;  %v2042_v35 = vmax.f32.f32 %v2038_v50, %v2030_v20 }
0x1189   :  { %v2001_v24 = vpop.f32.mrf.mxu0 }
0x118a   :  { %v2032_v18 = vand.u32 2147483647, %v2001_v24  ;;  %v2045_v33 = vmax.f32.f32 %v2041_v54, %v2033_v16 }
0x118b   :  { %v3116_v43 = vpop.f32.mrf.mxu0 }
0x118c   :  { %v2035_v47 = vand.u32 2147483647, %v3116_v43  ;;  %v2044_v56 = vmax.f32.f32 %v2040_v1, %v2032_v18 }
0x118d   :  { %v2011_v60 = vpop.f32.mrf.mxu0 }
0x118e   :  { %v2034_v36 = vand.u32 2147483647, %v2011_v60  ;;  %v2047_v42 = vmax.f32.f32 %v2043_v55, %v2035_v47  ;;  %v2048_v46 = vmax.f32.f32 %v2044_v56, %v2045_v33 }
0x1190   :  { %v2046_v30 = vmax.f32.f32 %v2042_v35, %v2034_v36 }
0x1192   :  { %v2049_v51 = vmax.f32.f32 %v2046_v30, %v2047_v42 }
0x1194   :  { %v2050_v28 = vmax.f32.f32 %v2048_v46, %v2049_v51 }
0x1196   :  { %2051 = vmax.xlane.f32.xlu0 %v2050_v28 }
0x121f   :  { %v2052_v38 = vpop.xlane.xlu0 %2051 }
0x1220   :  { %v2053_v62 = vrot.slane %v2052_v38, 4 }
0x1222   :  { %v2054_v19 = vmax.f32 %v2052_v38, %v2053_v62 }
0x1224   :  { %v2055_v53 = vrot.slane %v2054_v19, 2 }
0x1226   :  { %v2056_v48 = vmax.f32 %v2054_v19, %v2055_v53 }
0x1228   :  { %v2057_v49 = vrot.slane %v2056_v48, 1 }
0x122a   :  { %v2058_v37 = vmax.f32 %v2056_v48, %v2057_v49 }
0x122c   :  { %3191 = vpush %v2058_v37 }
0x125d   :  { %s3192_s23 = spop %3191 }
0x125e   :  { %v2060_v58 = vstv %s3192_s23 }
0x125f   :  { %v2061_v61 = vmax.f32 %v2060_v58, 1e-30 }
0x1261   :  { %3235 = vrcp.f32 %v2061_v61 }
0x126e   :  { %v3236_v15 = vpop.eup %3235 }
0x126f   :  { %v3908_v27 = vmul.f32 %v3236_v15, %v3116_v43  ;;  %v2068_v17 = vmul.f32 %v3236_v15, %v1941_v23  ;;  %v2082_v31 = vmul.f32 %v3236_v15, %v2011_v60  ;;  %3237 = vlog2.f32 %v3236_v15 }
0x1270   :  { %v2081_v29 = vmul.f32 %v3236_v15, %v3113_v0  ;;  %v2080_v12 = vmul.f32 %v3236_v15, %v2001_v24  ;;  %v2079_v2 = vmul.f32 %v3236_v15, %v3893_v5  ;;  %v2078_v23 = vmul.f32 %v3236_v15, %v3895_v11 }
0x1271   :  { %3117 = vmatprep.subr.mxu1 %v3908_v27  ;;  %3149 = vmatprep.mubr.f32.mxu1 %v2068_v17  ;;  %v2077_v3 = vmul.f32 %v3236_v15, %v3889_v4  ;;  %v2076_v8 = vmul.f32 %v3236_v15, %v3891_v21  ;;  %v2075_v9 = vmul.f32 %v3236_v15, %v3885_v45 }
0x1272   :  { %3118 = vmatpush3.msra.mxu1 %v3908_v27  ;;  %v2074_v5 = vmul.f32 %v3236_v15, %v3887_v10  ;;  %v2073_v11 = vmul.f32 %v3236_v15, %v3881_v34  ;;  %v2072_v21 = vmul.f32 %v3236_v15, %v3883_v57  ;;  %v2071_v45 = vmul.f32 %v3236_v15, %v3877_v32 }
0x1273   :  { %3119 = vmatprep.subr.mxu1 %v2082_v31  ;;  %v2070_v10 = vmul.f32 %v3236_v15, %v3879_v13  ;;  %v2069_v34 = vmul.f32 %v3236_v15, %v3875_v6 }
0x1274   :  { %3120 = vmatpush3.msra.mxu1 %v2082_v31 }
0x1275   :  { %3121 = vmatprep.subr.mxu1 %v2081_v29 }
0x1276   :  { %3122 = vmatpush3.msra.mxu1 %v2081_v29 }
0x1277   :  { %3123 = vmatprep.subr.mxu1 %v2080_v12 }
0x1278   :  { %3124 = vmatpush3.msra.mxu1 %v2080_v12 }
0x1279   :  { %3125 = vmatprep.subr.mxu1 %v2079_v2 }
0x127a   :  { %3126 = vmatpush3.msra.mxu1 %v2079_v2 }
0x127b   :  { %3127 = vmatprep.subr.mxu1 %v2078_v23 }
0x127c   :  { %3128 = vmatpush3.msra.mxu1 %v2078_v23  ;;  %v3238_v0 = vpop.eup %3237 }
0x127d   :  { %3129 = vmatprep.subr.mxu1 %v2077_v3  ;;  %v2065_v7 = vmul.f32 0.6931472, %v3238_v0 }
0x127e   :  { %3130 = vmatpush3.msra.mxu1 %v2077_v3 }
0x127f   :  { %3131 = vmatprep.subr.mxu1 %v2076_v8  ;;  %v2066_v39 = vmul.f32 0.001953125, %v2065_v7 }
0x1280   :  { %3132 = vmatpush3.msra.mxu1 %v2076_v8 }
0x1281   :  { %3133 = vmatprep.subr.mxu1 %v2075_v9  ;;  %v3922_v4 = vsub.f32 %v1858_v52, %v2066_v39 }
0x1282   :  { %3134 = vmatpush3.msra.mxu1 %v2075_v9 }
0x1283   :  { %3135 = vmatprep.subr.mxu1 %v2074_v5 }
0x1284   :  { %3136 = vmatpush3.msra.mxu1 %v2074_v5 }
0x1285   :  { %3137 = vmatprep.subr.mxu1 %v2073_v11 }
0x1286   :  { %3138 = vmatpush3.msra.mxu1 %v2073_v11 }
0x1287   :  { %3139 = vmatprep.subr.mxu1 %v2072_v21 }
0x1288   :  { %3140 = vmatpush3.msra.mxu1 %v2072_v21 }
0x1289   :  { %3141 = vmatprep.subr.mxu1 %v2071_v45 }
0x128a   :  { %3142 = vmatpush3.msra.mxu1 %v2071_v45 }
0x128b   :  { %3143 = vmatprep.subr.mxu1 %v2070_v10 }
0x128c   :  { %3144 = vmatpush3.msra.mxu1 %v2070_v10 }
0x128d   :  { %3145 = vmatprep.subr.mxu1 %v2069_v34 }
0x128e   :  { %3146 = vmatpush3.msra.mxu1 %v2069_v34 }
0x128f   :  { %3147 = vmatprep.subr.mxu1 %v2068_v17 }
0x1290   :  { %3148 = vmatpush3.msra.mxu1 %v2068_v17 }
0x1291   :  { %3150 = vmatmul.mubr.f32.vlgmr.msra.gmra.mxu1 %v2069_v34 }
0x1292   :  { %3152 = vmatprep.mubr.f32.mxu1 %v2070_v10 }
0x1295   :  { %3153 = vmatmul.mubr.f32.gmra.mxu1 %v2071_v45 }
0x1296   :  { %3155 = vmatprep.mubr.f32.mxu1 %v2072_v21 }
0x1299   :  { %3156 = vmatmul.mubr.f32.gmra.mxu1 %v2073_v11 }
0x129a   :  { %3158 = vmatprep.mubr.f32.mxu1 %v2074_v5 }
0x129d   :  { %3159 = vmatmul.mubr.f32.gmra.mxu1 %v2075_v9 }
0x129e   :  { %3161 = vmatprep.mubr.f32.mxu1 %v2076_v8 }
0x12a1   :  { %3162 = vmatmul.mubr.f32.gmra.mxu1 %v2077_v3 }
0x12a2   :  { %3164 = vmatprep.mubr.f32.mxu1 %v2078_v23 }
0x12a5   :  { %3165 = vmatmul.mubr.f32.gmra.mxu1 %v2079_v2 }
0x12a6   :  { %3167 = vmatprep.mubr.f32.mxu1 %v2080_v12 }
0x12a9   :  { %3168 = vmatmul.mubr.f32.gmra.mxu1 %v2081_v29 }
0x12aa   :  { %3170 = vmatprep.mubr.f32.mxu1 %v2082_v31 }
0x12ad   :  { %3171 = vmatmul.mubr.f32.gmra.mxu1 %v3908_v27 }
0x1351   :  { %v3151_v41 = vpop.f32.mrf.mxu1 }
0x1352   :  { %v2230_v32 = vmul.f32 %v3151_v41, %v3151_v41 }
0x1353   :  { %v2150_v59 = vpop.f32.mrf.mxu1 }
0x1354   :  { %v2229_v52 = vmul.f32 %v2150_v59, %v2150_v59 }
0x1355   :  { %v3154_v6 = vpop.f32.mrf.mxu1 }
0x1356   :  { %v2245_v57 = vadd.f32 %v2230_v32, %v2229_v52  ;;  %v2232_v44 = vmul.f32 %v3154_v6, %v3154_v6 }
0x1357   :  { %v2160_v13 = vpop.f32.mrf.mxu1 }
0x1358   :  { %v2231_v40 = vmul.f32 %v2160_v13, %v2160_v13 }
0x1359   :  { %v3157_v63 = vpop.f32.mrf.mxu1 }
0x135a   :  { %v2246_v24 = vadd.f32 %v2245_v57, %v2231_v40  ;;  %v2234_v22 = vmul.f32 %v3157_v63, %v3157_v63 }
0x135b   :  { %v2170_v25 = vpop.f32.mrf.mxu1 }
0x135c   :  { %v2233_v26 = vmul.f32 %v2170_v25, %v2170_v25  ;;  %v2247_v20 = vadd.f32 %v2246_v24, %v2232_v44 }
0x135d   :  { %v3160_v18 = vpop.f32.mrf.mxu1 }
0x135e   :  { %v2248_v14 = vadd.f32 %v2247_v20, %v2233_v26  ;;  %v2236_v47 = vmul.f32 %v3160_v18, %v3160_v18 }
0x135f   :  { %v2180_v43 = vpop.f32.mrf.mxu1 }
0x1360   :  { %v2235_v50 = vmul.f32 %v2180_v43, %v2180_v43  ;;  %v2249_v1 = vadd.f32 %v2248_v14, %v2234_v22 }
0x1361   :  { %v3163_v16 = vpop.f32.mrf.mxu1 }
0x1362   :  { %v2250_v54 = vadd.f32 %v2249_v1, %v2235_v50  ;;  %v2238_v36 = vmul.f32 %v3163_v16, %v3163_v16 }
0x1363   :  { %v2190_v60 = vpop.f32.mrf.mxu1 }
0x1364   :  { %v2237_v55 = vmul.f32 %v2190_v60, %v2190_v60  ;;  %v2251_v35 = vadd.f32 %v2250_v54, %v2236_v47 }
0x1365   :  { %v3166_v56 = vpop.f32.mrf.mxu1 }
0x1366   :  { %v2252_v33 = vadd.f32 %v2251_v35, %v2237_v55  ;;  %v2240_v28 = vmul.f32 %v3166_v56, %v3166_v56 }
0x1367   :  { %v2200_v42 = vpop.f32.mrf.mxu1 }
0x1368   :  { %v2239_v30 = vmul.f32 %v2200_v42, %v2200_v42  ;;  %v2253_v46 = vadd.f32 %v2252_v33, %v2238_v36 }
0x1369   :  { %v3169_v51 = vpop.f32.mrf.mxu1 }
0x136a   :  { %v2254_v38 = vadd.f32 %v2253_v46, %v2239_v30  ;;  %v2242_v49 = vmul.f32 %v3169_v51, %v3169_v51 }
0x136b   :  { %v2210_v62 = vpop.f32.mrf.mxu1 }
0x136c   :  { %v2241_v19 = vmul.f32 %v2210_v62, %v2210_v62  ;;  %v2255_v53 = vadd.f32 %v2254_v38, %v2240_v28 }
0x136d   :  { %v3172_v48 = vpop.f32.mrf.mxu1 }
0x136e   :  { %v2256_v37 = vadd.f32 %v2255_v53, %v2241_v19  ;;  %v2244_v27 = vmul.f32 %v3172_v48, %v3172_v48 }
0x136f   :  { %v2220_v58 = vpop.f32.mrf.mxu1 }
0x1370   :  { %v2243_v61 = vmul.f32 %v2220_v58, %v2220_v58  ;;  %v2257_v15 = vadd.f32 %v2256_v37, %v2242_v49 }
0x1372   :  { %v2258_v17 = vadd.f32 %v2257_v15, %v2243_v61 }
0x1374   :  { %v2259_v31 = vadd.f32 %v2258_v17, %v2244_v27 }
0x1376   :  { %2260 = vadd.xlane.f32.xlu1 %v2259_v31 }
0x13ff   :  { %v2261_v29 = vpop.xlane.xlu1 %2260 }
0x1400   :  { %v2262_v12 = vrot.slane %v2261_v29, 4 }
0x1402   :  { %v2263_v2 = vadd.f32 %v2262_v12, %v2261_v29 }
0x1404   :  { %v2264_v23 = vrot.slane %v2263_v2, 2 }
0x1406   :  { %v2265_v3 = vadd.f32 %v2264_v23, %v2263_v2 }
0x1408   :  { %v2266_v8 = vrot.slane %v2265_v3, 1 }
0x140a   :  { %v2267_v0 = vadd.f32 %v2266_v8, %v2265_v3 }
0x140c   :  { %3193 = vpush %v2267_v0 }
0x143d   :  { %s3194_s24 = spop %3193 }
0x143e   :  { %v2269_v9 = vstv %s3194_s24 }
0x143f   :  { %3239 = vlog2.f32 %v2269_v9 }
0x144c   :  { %v3240_v7 = vpop.eup %3239 }
0x144d   :  { %v2272_v5 = vmul.f32 0.6931472, %v3240_v7 }
0x144f   :  { %v2273_v39 = vmul.f32 0.00048828125, %v2272_v5 }
0x1451   :  { %v2274_v11 = vadd.f32 %v2273_v39, %v3922_v4 }
0x1453   :  { %v2275_v21 = vmul.f32 1.442695, %v2274_v11 }
0x1455   :  { %3241 = vpow2.f32 %v2275_v21 }
0x1462   :  { %v3242_v45 = vpop.eup %3241 }
0x1463   :  { %2278 = vst.msk [vmem:[#allocation2] sm:$0x1] %vm2277_vm0, %v3242_v45 }
0x1464   :  { %3254 = shalt.err (!%p3251_p4)
}
0x1465   :  { %2288 = dma.vmem_to_hbm [thread:$0]  %s2286_s26, 16, %s3935_s2, [#allocation3]  }
0x1466   :  { %3263 = dma.done.wait [#allocation3], 16  }
0x1467   :  { %3264 = vsyncadd [#allocation3], 4294967280 }
0x1468   :  { %2292 = vsyncpa [#allocation3], 1 }

</bundles_post_ra>
